<compile_context>
chip_gen: v5e
topology: v5e:2x2
jax: 0.10.0
libtpu: 0.0.40
codegen_flags: <defaults>
</compile_context>

<pallas_src>
import jax
import jax.numpy as jnp
from jax.experimental import pallas as pl
from jax.experimental.pallas import tpu as pltpu


def _same_pad_left(kernel_size, dilation):
    # stride == 1: total SAME padding = (K - 1) * dilation
    total = (kernel_size - 1) * dilation
    return total // 2


def _make_downblock_kernel(N, L, Cin, Cout, K, dilation, pad_l, eps):
    Lh = L // 2

    def conv(load_chan, w_ref, cin):
        """out[n,o,l] = sum_{c,k} w[o,c,k] * src[n,c,l + k*dilation - pad_l]
        (zero outside [0, L)): SAME-padded Conv1d, stride 1, no bias.

        load_chan(c) returns the (N, 1, L) channel-c row of the source ref.
        Taps are built with pltpu.roll + an iota mask, so no zero-padded
        staging buffer (and no buffer zero-fill) is needed.
        """
        lane = jax.lax.broadcasted_iota(jnp.int32, (1, 1, L), 2)
        offs = [k * dilation - pad_l for k in range(K)]
        # Masks hoisted out of the channel loop (reused for every c).
        masks = [None if off == 0 else ((lane + off >= 0) & (lane + off < L))
                 for off in offs]
        acc = jnp.zeros((N, Cout, L), jnp.float32)
        for c in range(cin):
            row = load_chan(c)                                  # (N, 1, L)
            for k, off in enumerate(offs):
                if off == 0:
                    tap = row
                else:
                    tap = pltpu.roll(row, shift=(-off) % L, axis=2)
                    tap = jnp.where(masks[k], tap, 0.0)
                # (Cout, 1) weight column * (N, 1, L) tap -> (N, Cout, L) VPU MAC
                acc = acc + w_ref[c * K + k] * tap
        return acc

    def bn_relu(acc, g_ref, b_ref):
        """Training-mode BatchNorm1d (biased stats over N, L) + ReLU, with the
        statistics fused into a single sum / sum-of-squares sweep."""
        inv_cnt = 1.0 / float(N * L)
        s = jnp.sum(jnp.sum(acc, axis=2, keepdims=True), axis=0, keepdims=True)
        ss = jnp.sum(jnp.sum(acc * acc, axis=2, keepdims=True), axis=0,
                     keepdims=True)
        mean = s * inv_cnt                                      # (1, Cout, 1)
        var = jnp.maximum(ss * inv_cnt - mean * mean, 0.0)
        inv = jax.lax.rsqrt(var + eps)
        scale = g_ref[...] * inv                                # (1, Cout, 1)
        shift = b_ref[...] - mean * scale                       # (1, Cout, 1)
        return jnp.maximum(acc * scale + shift, 0.0)

    def kernel(x_ref, w1_ref, g1_ref, b1_ref, w2_ref, g2_ref, b2_ref,
               x_out_ref, xp_out_ref, h1_ref):
        # ConvAct1d #1 (channels read straight from the NCL input ref).
        acc1 = conv(lambda c: x_ref[:, pl.ds(c, 1), :], w1_ref, Cin)
        h1_ref[...] = bn_relu(acc1, g1_ref, b1_ref)

        # ConvAct1d #2 (channels read from the compact, lane-dense, unpadded
        # h1 scratch -- written once, read once, never zero-filled).
        acc2 = conv(lambda c: h1_ref[:, pl.ds(c, 1), :], w2_ref, Cout)
        h2 = bn_relu(acc2, g2_ref, b2_ref)
        x_out_ref[...] = h2

        # MaxPool1d(kernel=2, stride=2) from the in-register h2:
        #   m[..., 2j] = max(h2[..., 2j], h2[..., 2j+1])   (lane roll + max)
        # then gather the even lanes with a 0/1 selection matmul (MXU is idle).
        m = jnp.maximum(h2, pltpu.roll(h2, shift=L - 1, axis=2))
        row_i = jax.lax.broadcasted_iota(jnp.int32, (L, Lh), 0)
        col_i = jax.lax.broadcasted_iota(jnp.int32, (L, Lh), 1)
        sel = jnp.where(row_i == 2 * col_i, 1.0, 0.0)           # (L, Lh) f32
        for n in range(N):
            xp_out_ref[n, :, :] = jnp.dot(m[n], sel,
                                          preferred_element_type=jnp.float32)

    return kernel


def downblock_forward(x_ncl, w1_oik, g1, b1, w2_oik, g2, b2,
                      *, kernel_size, stride=1, dilation=1, eps=1e-5):
    """x_ncl: (N, C_in, L) in PyTorch layout. Returns (x, xp) in (N, C_out, *)."""
    if stride != 1:
        # TODO(synk): stride > 1 changes the SAME-padded output length
        # (ceil(L/stride)); DownBlock uses the default stride=1.
        raise NotImplementedError("only stride=1 is supported")
    N, Cin, L = x_ncl.shape
    Cout = w1_oik.shape[0]
    K = kernel_size
    pad_l = _same_pad_left(K, dilation)

    # Weights packed so w_ref[c*K + k] is the (Cout, 1) column w_torch[:, c, k].
    # Activations/outputs stay in NCL: no transposes anywhere in the wrapper.
    def pack_w(w):
        cin = w.shape[1]
        return (jnp.transpose(w.astype(jnp.float32), (1, 2, 0))
                .reshape(cin * K, Cout)[:, :, None])

    kern = _make_downblock_kernel(N, L, Cin, Cout, K, dilation, pad_l, eps)

    x_out, xp_out = pl.pallas_call(
        kern,
        out_shape=(jax.ShapeDtypeStruct((N, Cout, L), jnp.float32),
                   jax.ShapeDtypeStruct((N, Cout, L // 2), jnp.float32)),
        in_specs=[pl.BlockSpec(memory_space=pltpu.MemorySpace.VMEM)] * 7,
        out_specs=(pl.BlockSpec(memory_space=pltpu.MemorySpace.VMEM),
                   pl.BlockSpec(memory_space=pltpu.MemorySpace.VMEM)),
        scratch_shapes=[pltpu.VMEM((N, Cout, L), jnp.float32)],   # compact h1
    )(x_ncl.astype(jnp.float32),
      pack_w(w1_oik),
      g1.astype(jnp.float32).reshape(Cout, 1),
      b1.astype(jnp.float32).reshape(Cout, 1),
      pack_w(w2_oik),
      g2.astype(jnp.float32).reshape(Cout, 1),
      b2.astype(jnp.float32).reshape(Cout, 1))
    return x_out, xp_out


def _reference(x, w1, g1, b1, w2, g2, b2, *, kernel_size, dilation=1, eps=1e-5):
    """Pure-JAX reference mirroring the PyTorch module (training-mode BN)."""
    def conv_act(h, w, g, b):
        total = (kernel_size - 1) * dilation
        lpad = total // 2
        hp = jnp.pad(h, ((0, 0), (0, 0), (lpad, total - lpad)))
        y = jax.lax.conv_general_dilated(
            hp, w, window_strides=(1,), padding="VALID",
            rhs_dilation=(dilation,), dimension_numbers=("NCH", "OIH", "NCH"))
        mean = jnp.mean(y, axis=(0, 2), keepdims=True)
        var = jnp.mean((y - mean) ** 2, axis=(0, 2), keepdims=True)
        y = ((y - mean) / jnp.sqrt(var + eps) * g.reshape(1, -1, 1)
             + b.reshape(1, -1, 1))
        return jnp.maximum(y, 0.0)

    h1 = conv_act(x, w1, g1, b1)
    h2 = conv_act(h1, w2, g2, b2)
    n, c, l = h2.shape
    xp = jnp.max(h2.reshape(n, c, l // 2, 2), axis=-1)
    return h2, xp


if __name__ == "__main__":
    # Small shapes consistent with DownBlock(interval_size=256, in=4, out=8, k=3).
    N, Cin, Cout, L, K = 2, 4, 8, 256, 3

    key = jax.random.PRNGKey(0)
    kx, kw1, kw2, kg1, kb1, kg2, kb2 = jax.random.split(key, 7)

    x = jax.random.normal(kx, (N, Cin, L), dtype=jnp.float32)
    # Conv1d weights, PyTorch layout (out_channels, in_channels, K), bias=False.
    w1 = jax.random.normal(kw1, (Cout, Cin, K), dtype=jnp.float32) * 0.2
    w2 = jax.random.normal(kw2, (Cout, Cout, K), dtype=jnp.float32) * 0.2
    # BatchNorm1d affine params (perturbed so the affine math is exercised).
    g1 = 1.0 + 0.1 * jax.random.normal(kg1, (Cout,), dtype=jnp.float32)
    b1 = 0.05 * jax.random.normal(kb1, (Cout,), dtype=jnp.float32)
    g2 = 1.0 + 0.1 * jax.random.normal(kg2, (Cout,), dtype=jnp.float32)
    b2 = 0.05 * jax.random.normal(kb2, (Cout,), dtype=jnp.float32)

    x_out, xp_out = downblock_forward(x, w1, g1, b1, w2, g2, b2,
                                      kernel_size=K, stride=1, dilation=1)
    jax.block_until_ready((x_out, xp_out))

    assert x_out.shape == (N, Cout, L)
    assert xp_out.shape == (N, Cout, L // 2)

    # Numerical check against a pure-JAX reference of the PyTorch module.
    x_ref, xp_ref = _reference(x, w1, g1, b1, w2, g2, b2,
                               kernel_size=K, dilation=1)
    assert bool(jnp.allclose(x_out, x_ref, atol=2e-3, rtol=2e-3)), "x mismatch"
    assert bool(jnp.allclose(xp_out, xp_ref, atol=2e-3, rtol=2e-3)), "xp mismatch"

    print("KERNEL_OK")
</pallas_src>

<mosaic_0001>
module attributes {stable_mosaic.version = 11 : i64} {
  func.func @kernel(%arg0: memref<2x4x256xf32, #tpu.memory_space<vmem>>, %arg1: memref<12x8x1xf32, #tpu.memory_space<vmem>>, %arg2: memref<8x1xf32, #tpu.memory_space<vmem>>, %arg3: memref<8x1xf32, #tpu.memory_space<vmem>>, %arg4: memref<24x8x1xf32, #tpu.memory_space<vmem>>, %arg5: memref<8x1xf32, #tpu.memory_space<vmem>>, %arg6: memref<8x1xf32, #tpu.memory_space<vmem>>, %arg7: memref<2x8x256xf32, #tpu.memory_space<vmem>>, %arg8: memref<2x8x128xf32, #tpu.memory_space<vmem>>, %arg9: memref<2x8x256xf32, #tpu.memory_space<vmem>>) attributes {dimension_semantics = [], scalar_prefetch = 0 : i64, scratch_operands = 1 : i64, tpu.core_type = #tpu.core_type<tc>} {
    %0 = tpu.iota {dimensions = array<i32: 2>} : vector<1x1x256xi32>
    %c-1_i32 = arith.constant -1 : i32
    %1 = vector.broadcast %c-1_i32 : i32 to vector<1x1x256xi32>
    %2 = arith.addi %0, %1 : vector<1x1x256xi32>
    %c0_i32 = arith.constant 0 : i32
    %3 = vector.broadcast %c0_i32 : i32 to vector<1x1x256xi32>
    %4 = arith.cmpi sge, %2, %3 : vector<1x1x256xi32>
    %c-1_i32_0 = arith.constant -1 : i32
    %5 = vector.broadcast %c-1_i32_0 : i32 to vector<1x1x256xi32>
    %6 = arith.addi %0, %5 : vector<1x1x256xi32>
    %c256_i32 = arith.constant 256 : i32
    %7 = vector.broadcast %c256_i32 : i32 to vector<1x1x256xi32>
    %8 = arith.cmpi slt, %6, %7 : vector<1x1x256xi32>
    %9 = arith.andi %4, %8 : vector<1x1x256xi1>
    %c1_i32 = arith.constant 1 : i32
    %10 = vector.broadcast %c1_i32 : i32 to vector<1x1x256xi32>
    %11 = arith.addi %0, %10 : vector<1x1x256xi32>
    %c0_i32_1 = arith.constant 0 : i32
    %12 = vector.broadcast %c0_i32_1 : i32 to vector<1x1x256xi32>
    %13 = arith.cmpi sge, %11, %12 : vector<1x1x256xi32>
    %c1_i32_2 = arith.constant 1 : i32
    %14 = vector.broadcast %c1_i32_2 : i32 to vector<1x1x256xi32>
    %15 = arith.addi %0, %14 : vector<1x1x256xi32>
    %c256_i32_3 = arith.constant 256 : i32
    %16 = vector.broadcast %c256_i32_3 : i32 to vector<1x1x256xi32>
    %17 = arith.cmpi slt, %15, %16 : vector<1x1x256xi32>
    %18 = arith.andi %13, %17 : vector<1x1x256xi1>
    %cst = arith.constant 0.000000e+00 : f32
    %19 = vector.broadcast %cst : f32 to vector<2x8x256xf32>
    %c0 = arith.constant 0 : index
    %c0_4 = arith.constant 0 : index
    %c0_5 = arith.constant 0 : index
    %20 = vector.load %arg0[%c0, %c0_4, %c0_5] : memref<2x4x256xf32, #tpu.memory_space<vmem>>, vector<2x1x256xf32>
    %c1_i32_6 = arith.constant 1 : i32
    %21 = tpu.dynamic_rotate %20 by %c1_i32_6 dim 2 : vector<2x1x256xf32>, i32 -> vector<2x1x256xf32>
    %cst_7 = arith.constant 0.000000e+00 : f32
    %22 = vector.shape_cast %9 : vector<1x1x256xi1> to vector<1x1x256xi1>
    %23 = vector.broadcast %22 : vector<1x1x256xi1> to vector<2x1x256xi1>
    %24 = vector.broadcast %cst_7 : f32 to vector<2x1x256xf32>
    %25 = arith.select %23, %21, %24 : vector<2x1x256xi1>, vector<2x1x256xf32>
    %c0_8 = arith.constant 0 : index
    %c0_9 = arith.constant 0 : index
    %c0_10 = arith.constant 0 : index
    %26 = vector.load %arg1[%c0_8, %c0_9, %c0_10] : memref<12x8x1xf32, #tpu.memory_space<vmem>>, vector<1x8x1xf32>
    %27 = vector.shape_cast %26 : vector<1x8x1xf32> to vector<8x1xf32>
    %28 = vector.shape_cast %27 : vector<8x1xf32> to vector<1x8x1xf32>
    %29 = vector.broadcast %28 : vector<1x8x1xf32> to vector<2x8x256xf32>
    %30 = vector.broadcast %25 : vector<2x1x256xf32> to vector<2x8x256xf32>
    %31 = arith.mulf %29, %30 : vector<2x8x256xf32>
    %32 = arith.addf %19, %31 : vector<2x8x256xf32>
    %c1 = arith.constant 1 : index
    %c0_11 = arith.constant 0 : index
    %c0_12 = arith.constant 0 : index
    %33 = vector.load %arg1[%c1, %c0_11, %c0_12] : memref<12x8x1xf32, #tpu.memory_space<vmem>>, vector<1x8x1xf32>
    %34 = vector.shape_cast %33 : vector<1x8x1xf32> to vector<8x1xf32>
    %35 = vector.shape_cast %34 : vector<8x1xf32> to vector<1x8x1xf32>
    %36 = vector.broadcast %35 : vector<1x8x1xf32> to vector<2x8x256xf32>
    %37 = vector.broadcast %20 : vector<2x1x256xf32> to vector<2x8x256xf32>
    %38 = arith.mulf %36, %37 : vector<2x8x256xf32>
    %39 = arith.addf %32, %38 : vector<2x8x256xf32>
    %c255_i32 = arith.constant 255 : i32
    %40 = tpu.dynamic_rotate %20 by %c255_i32 dim 2 : vector<2x1x256xf32>, i32 -> vector<2x1x256xf32>
    %cst_13 = arith.constant 0.000000e+00 : f32
    %41 = vector.shape_cast %18 : vector<1x1x256xi1> to vector<1x1x256xi1>
    %42 = vector.broadcast %41 : vector<1x1x256xi1> to vector<2x1x256xi1>
    %43 = vector.broadcast %cst_13 : f32 to vector<2x1x256xf32>
    %44 = arith.select %42, %40, %43 : vector<2x1x256xi1>, vector<2x1x256xf32>
    %c2 = arith.constant 2 : index
    %c0_14 = arith.constant 0 : index
    %c0_15 = arith.constant 0 : index
    %45 = vector.load %arg1[%c2, %c0_14, %c0_15] : memref<12x8x1xf32, #tpu.memory_space<vmem>>, vector<1x8x1xf32>
    %46 = vector.shape_cast %45 : vector<1x8x1xf32> to vector<8x1xf32>
    %47 = vector.shape_cast %46 : vector<8x1xf32> to vector<1x8x1xf32>
    %48 = vector.broadcast %47 : vector<1x8x1xf32> to vector<2x8x256xf32>
    %49 = vector.broadcast %44 : vector<2x1x256xf32> to vector<2x8x256xf32>
    %50 = arith.mulf %48, %49 : vector<2x8x256xf32>
    %51 = arith.addf %39, %50 : vector<2x8x256xf32>
    %c0_16 = arith.constant 0 : index
    %c1_17 = arith.constant 1 : index
    %c0_18 = arith.constant 0 : index
    %52 = vector.load %arg0[%c0_16, %c1_17, %c0_18] : memref<2x4x256xf32, #tpu.memory_space<vmem>>, vector<2x1x256xf32>
    %c1_i32_19 = arith.constant 1 : i32
    %53 = tpu.dynamic_rotate %52 by %c1_i32_19 dim 2 : vector<2x1x256xf32>, i32 -> vector<2x1x256xf32>
    %cst_20 = arith.constant 0.000000e+00 : f32
    %54 = vector.shape_cast %9 : vector<1x1x256xi1> to vector<1x1x256xi1>
    %55 = vector.broadcast %54 : vector<1x1x256xi1> to vector<2x1x256xi1>
    %56 = vector.broadcast %cst_20 : f32 to vector<2x1x256xf32>
    %57 = arith.select %55, %53, %56 : vector<2x1x256xi1>, vector<2x1x256xf32>
    %c3 = arith.constant 3 : index
    %c0_21 = arith.constant 0 : index
    %c0_22 = arith.constant 0 : index
    %58 = vector.load %arg1[%c3, %c0_21, %c0_22] : memref<12x8x1xf32, #tpu.memory_space<vmem>>, vector<1x8x1xf32>
    %59 = vector.shape_cast %58 : vector<1x8x1xf32> to vector<8x1xf32>
    %60 = vector.shape_cast %59 : vector<8x1xf32> to vector<1x8x1xf32>
    %61 = vector.broadcast %60 : vector<1x8x1xf32> to vector<2x8x256xf32>
    %62 = vector.broadcast %57 : vector<2x1x256xf32> to vector<2x8x256xf32>
    %63 = arith.mulf %61, %62 : vector<2x8x256xf32>
    %64 = arith.addf %51, %63 : vector<2x8x256xf32>
    %c4 = arith.constant 4 : index
    %c0_23 = arith.constant 0 : index
    %c0_24 = arith.constant 0 : index
    %65 = vector.load %arg1[%c4, %c0_23, %c0_24] : memref<12x8x1xf32, #tpu.memory_space<vmem>>, vector<1x8x1xf32>
    %66 = vector.shape_cast %65 : vector<1x8x1xf32> to vector<8x1xf32>
    %67 = vector.shape_cast %66 : vector<8x1xf32> to vector<1x8x1xf32>
    %68 = vector.broadcast %67 : vector<1x8x1xf32> to vector<2x8x256xf32>
    %69 = vector.broadcast %52 : vector<2x1x256xf32> to vector<2x8x256xf32>
    %70 = arith.mulf %68, %69 : vector<2x8x256xf32>
    %71 = arith.addf %64, %70 : vector<2x8x256xf32>
    %c255_i32_25 = arith.constant 255 : i32
    %72 = tpu.dynamic_rotate %52 by %c255_i32_25 dim 2 : vector<2x1x256xf32>, i32 -> vector<2x1x256xf32>
    %cst_26 = arith.constant 0.000000e+00 : f32
    %73 = vector.shape_cast %18 : vector<1x1x256xi1> to vector<1x1x256xi1>
    %74 = vector.broadcast %73 : vector<1x1x256xi1> to vector<2x1x256xi1>
    %75 = vector.broadcast %cst_26 : f32 to vector<2x1x256xf32>
    %76 = arith.select %74, %72, %75 : vector<2x1x256xi1>, vector<2x1x256xf32>
    %c5 = arith.constant 5 : index
    %c0_27 = arith.constant 0 : index
    %c0_28 = arith.constant 0 : index
    %77 = vector.load %arg1[%c5, %c0_27, %c0_28] : memref<12x8x1xf32, #tpu.memory_space<vmem>>, vector<1x8x1xf32>
    %78 = vector.shape_cast %77 : vector<1x8x1xf32> to vector<8x1xf32>
    %79 = vector.shape_cast %78 : vector<8x1xf32> to vector<1x8x1xf32>
    %80 = vector.broadcast %79 : vector<1x8x1xf32> to vector<2x8x256xf32>
    %81 = vector.broadcast %76 : vector<2x1x256xf32> to vector<2x8x256xf32>
    %82 = arith.mulf %80, %81 : vector<2x8x256xf32>
    %83 = arith.addf %71, %82 : vector<2x8x256xf32>
    %c0_29 = arith.constant 0 : index
    %c2_30 = arith.constant 2 : index
    %c0_31 = arith.constant 0 : index
    %84 = vector.load %arg0[%c0_29, %c2_30, %c0_31] : memref<2x4x256xf32, #tpu.memory_space<vmem>>, vector<2x1x256xf32>
    %c1_i32_32 = arith.constant 1 : i32
    %85 = tpu.dynamic_rotate %84 by %c1_i32_32 dim 2 : vector<2x1x256xf32>, i32 -> vector<2x1x256xf32>
    %cst_33 = arith.constant 0.000000e+00 : f32
    %86 = vector.shape_cast %9 : vector<1x1x256xi1> to vector<1x1x256xi1>
    %87 = vector.broadcast %86 : vector<1x1x256xi1> to vector<2x1x256xi1>
    %88 = vector.broadcast %cst_33 : f32 to vector<2x1x256xf32>
    %89 = arith.select %87, %85, %88 : vector<2x1x256xi1>, vector<2x1x256xf32>
    %c6 = arith.constant 6 : index
    %c0_34 = arith.constant 0 : index
    %c0_35 = arith.constant 0 : index
    %90 = vector.load %arg1[%c6, %c0_34, %c0_35] : memref<12x8x1xf32, #tpu.memory_space<vmem>>, vector<1x8x1xf32>
    %91 = vector.shape_cast %90 : vector<1x8x1xf32> to vector<8x1xf32>
    %92 = vector.shape_cast %91 : vector<8x1xf32> to vector<1x8x1xf32>
    %93 = vector.broadcast %92 : vector<1x8x1xf32> to vector<2x8x256xf32>
    %94 = vector.broadcast %89 : vector<2x1x256xf32> to vector<2x8x256xf32>
    %95 = arith.mulf %93, %94 : vector<2x8x256xf32>
    %96 = arith.addf %83, %95 : vector<2x8x256xf32>
    %c7 = arith.constant 7 : index
    %c0_36 = arith.constant 0 : index
    %c0_37 = arith.constant 0 : index
    %97 = vector.load %arg1[%c7, %c0_36, %c0_37] : memref<12x8x1xf32, #tpu.memory_space<vmem>>, vector<1x8x1xf32>
    %98 = vector.shape_cast %97 : vector<1x8x1xf32> to vector<8x1xf32>
    %99 = vector.shape_cast %98 : vector<8x1xf32> to vector<1x8x1xf32>
    %100 = vector.broadcast %99 : vector<1x8x1xf32> to vector<2x8x256xf32>
    %101 = vector.broadcast %84 : vector<2x1x256xf32> to vector<2x8x256xf32>
    %102 = arith.mulf %100, %101 : vector<2x8x256xf32>
    %103 = arith.addf %96, %102 : vector<2x8x256xf32>
    %c255_i32_38 = arith.constant 255 : i32
    %104 = tpu.dynamic_rotate %84 by %c255_i32_38 dim 2 : vector<2x1x256xf32>, i32 -> vector<2x1x256xf32>
    %cst_39 = arith.constant 0.000000e+00 : f32
    %105 = vector.shape_cast %18 : vector<1x1x256xi1> to vector<1x1x256xi1>
    %106 = vector.broadcast %105 : vector<1x1x256xi1> to vector<2x1x256xi1>
    %107 = vector.broadcast %cst_39 : f32 to vector<2x1x256xf32>
    %108 = arith.select %106, %104, %107 : vector<2x1x256xi1>, vector<2x1x256xf32>
    %c8 = arith.constant 8 : index
    %c0_40 = arith.constant 0 : index
    %c0_41 = arith.constant 0 : index
    %109 = vector.load %arg1[%c8, %c0_40, %c0_41] : memref<12x8x1xf32, #tpu.memory_space<vmem>>, vector<1x8x1xf32>
    %110 = vector.shape_cast %109 : vector<1x8x1xf32> to vector<8x1xf32>
    %111 = vector.shape_cast %110 : vector<8x1xf32> to vector<1x8x1xf32>
    %112 = vector.broadcast %111 : vector<1x8x1xf32> to vector<2x8x256xf32>
    %113 = vector.broadcast %108 : vector<2x1x256xf32> to vector<2x8x256xf32>
    %114 = arith.mulf %112, %113 : vector<2x8x256xf32>
    %115 = arith.addf %103, %114 : vector<2x8x256xf32>
    %c0_42 = arith.constant 0 : index
    %c3_43 = arith.constant 3 : index
    %c0_44 = arith.constant 0 : index
    %116 = vector.load %arg0[%c0_42, %c3_43, %c0_44] : memref<2x4x256xf32, #tpu.memory_space<vmem>>, vector<2x1x256xf32>
    %c1_i32_45 = arith.constant 1 : i32
    %117 = tpu.dynamic_rotate %116 by %c1_i32_45 dim 2 : vector<2x1x256xf32>, i32 -> vector<2x1x256xf32>
    %cst_46 = arith.constant 0.000000e+00 : f32
    %118 = vector.shape_cast %9 : vector<1x1x256xi1> to vector<1x1x256xi1>
    %119 = vector.broadcast %118 : vector<1x1x256xi1> to vector<2x1x256xi1>
    %120 = vector.broadcast %cst_46 : f32 to vector<2x1x256xf32>
    %121 = arith.select %119, %117, %120 : vector<2x1x256xi1>, vector<2x1x256xf32>
    %c9 = arith.constant 9 : index
    %c0_47 = arith.constant 0 : index
    %c0_48 = arith.constant 0 : index
    %122 = vector.load %arg1[%c9, %c0_47, %c0_48] : memref<12x8x1xf32, #tpu.memory_space<vmem>>, vector<1x8x1xf32>
    %123 = vector.shape_cast %122 : vector<1x8x1xf32> to vector<8x1xf32>
    %124 = vector.shape_cast %123 : vector<8x1xf32> to vector<1x8x1xf32>
    %125 = vector.broadcast %124 : vector<1x8x1xf32> to vector<2x8x256xf32>
    %126 = vector.broadcast %121 : vector<2x1x256xf32> to vector<2x8x256xf32>
    %127 = arith.mulf %125, %126 : vector<2x8x256xf32>
    %128 = arith.addf %115, %127 : vector<2x8x256xf32>
    %c10 = arith.constant 10 : index
    %c0_49 = arith.constant 0 : index
    %c0_50 = arith.constant 0 : index
    %129 = vector.load %arg1[%c10, %c0_49, %c0_50] : memref<12x8x1xf32, #tpu.memory_space<vmem>>, vector<1x8x1xf32>
    %130 = vector.shape_cast %129 : vector<1x8x1xf32> to vector<8x1xf32>
    %131 = vector.shape_cast %130 : vector<8x1xf32> to vector<1x8x1xf32>
    %132 = vector.broadcast %131 : vector<1x8x1xf32> to vector<2x8x256xf32>
    %133 = vector.broadcast %116 : vector<2x1x256xf32> to vector<2x8x256xf32>
    %134 = arith.mulf %132, %133 : vector<2x8x256xf32>
    %135 = arith.addf %128, %134 : vector<2x8x256xf32>
    %c255_i32_51 = arith.constant 255 : i32
    %136 = tpu.dynamic_rotate %116 by %c255_i32_51 dim 2 : vector<2x1x256xf32>, i32 -> vector<2x1x256xf32>
    %cst_52 = arith.constant 0.000000e+00 : f32
    %137 = vector.shape_cast %18 : vector<1x1x256xi1> to vector<1x1x256xi1>
    %138 = vector.broadcast %137 : vector<1x1x256xi1> to vector<2x1x256xi1>
    %139 = vector.broadcast %cst_52 : f32 to vector<2x1x256xf32>
    %140 = arith.select %138, %136, %139 : vector<2x1x256xi1>, vector<2x1x256xf32>
    %c11 = arith.constant 11 : index
    %c0_53 = arith.constant 0 : index
    %c0_54 = arith.constant 0 : index
    %141 = vector.load %arg1[%c11, %c0_53, %c0_54] : memref<12x8x1xf32, #tpu.memory_space<vmem>>, vector<1x8x1xf32>
    %142 = vector.shape_cast %141 : vector<1x8x1xf32> to vector<8x1xf32>
    %143 = vector.shape_cast %142 : vector<8x1xf32> to vector<1x8x1xf32>
    %144 = vector.broadcast %143 : vector<1x8x1xf32> to vector<2x8x256xf32>
    %145 = vector.broadcast %140 : vector<2x1x256xf32> to vector<2x8x256xf32>
    %146 = arith.mulf %144, %145 : vector<2x8x256xf32>
    %147 = arith.addf %135, %146 : vector<2x8x256xf32>
    %cst_55 = arith.constant dense<0.000000e+00> : vector<2x8xf32>
    %148 = vector.multi_reduction <add>, %147, %cst_55 [2] : vector<2x8x256xf32> to vector<2x8xf32>
    %149 = vector.shape_cast %148 : vector<2x8xf32> to vector<2x8x1xf32>
    %cst_56 = arith.constant dense<0.000000e+00> : vector<8x1xf32>
    %150 = vector.multi_reduction <add>, %149, %cst_56 [0] : vector<2x8x1xf32> to vector<8x1xf32>
    %151 = vector.shape_cast %150 : vector<8x1xf32> to vector<1x8x1xf32>
    %152 = arith.mulf %147, %147 : vector<2x8x256xf32>
    %cst_57 = arith.constant dense<0.000000e+00> : vector<2x8xf32>
    %153 = vector.multi_reduction <add>, %152, %cst_57 [2] : vector<2x8x256xf32> to vector<2x8xf32>
    %154 = vector.shape_cast %153 : vector<2x8xf32> to vector<2x8x1xf32>
    %cst_58 = arith.constant dense<0.000000e+00> : vector<8x1xf32>
    %155 = vector.multi_reduction <add>, %154, %cst_58 [0] : vector<2x8x1xf32> to vector<8x1xf32>
    %156 = vector.shape_cast %155 : vector<8x1xf32> to vector<1x8x1xf32>
    %cst_59 = arith.constant 0.001953125 : f32
    %157 = vector.broadcast %cst_59 : f32 to vector<1x8x1xf32>
    %158 = arith.mulf %151, %157 : vector<1x8x1xf32>
    %cst_60 = arith.constant 0.001953125 : f32
    %159 = vector.broadcast %cst_60 : f32 to vector<1x8x1xf32>
    %160 = arith.mulf %156, %159 : vector<1x8x1xf32>
    %161 = arith.mulf %158, %158 : vector<1x8x1xf32>
    %162 = arith.subf %160, %161 : vector<1x8x1xf32>
    %cst_61 = arith.constant 0.000000e+00 : f32
    %163 = vector.broadcast %cst_61 : f32 to vector<1x8x1xf32>
    %164 = arith.maximumf %162, %163 : vector<1x8x1xf32>
    %cst_62 = arith.constant 9.99999974E-6 : f32
    %165 = vector.broadcast %cst_62 : f32 to vector<1x8x1xf32>
    %166 = arith.addf %164, %165 : vector<1x8x1xf32>
    %167 = math.rsqrt %166 : vector<1x8x1xf32>
    %c0_63 = arith.constant 0 : index
    %c0_64 = arith.constant 0 : index
    %168 = vector.load %arg2[%c0_63, %c0_64] : memref<8x1xf32, #tpu.memory_space<vmem>>, vector<8x1xf32>
    %169 = vector.shape_cast %168 : vector<8x1xf32> to vector<1x8x1xf32>
    %170 = arith.mulf %169, %167 : vector<1x8x1xf32>
    %c0_65 = arith.constant 0 : index
    %c0_66 = arith.constant 0 : index
    %171 = vector.load %arg3[%c0_65, %c0_66] : memref<8x1xf32, #tpu.memory_space<vmem>>, vector<8x1xf32>
    %172 = arith.mulf %158, %170 : vector<1x8x1xf32>
    %173 = vector.shape_cast %171 : vector<8x1xf32> to vector<1x8x1xf32>
    %174 = arith.subf %173, %172 : vector<1x8x1xf32>
    %175 = vector.broadcast %170 : vector<1x8x1xf32> to vector<2x8x256xf32>
    %176 = arith.mulf %147, %175 : vector<2x8x256xf32>
    %177 = vector.broadcast %174 : vector<1x8x1xf32> to vector<2x8x256xf32>
    %178 = arith.addf %176, %177 : vector<2x8x256xf32>
    %cst_67 = arith.constant 0.000000e+00 : f32
    %179 = vector.broadcast %cst_67 : f32 to vector<2x8x256xf32>
    %180 = arith.maximumf %178, %179 : vector<2x8x256xf32>
    %c0_68 = arith.constant 0 : index
    %c0_69 = arith.constant 0 : index
    %c0_70 = arith.constant 0 : index
    %181 = vector.load %arg9[%c0_68, %c0_69, %c0_70] : memref<2x8x256xf32, #tpu.memory_space<vmem>>, vector<2x8x256xf32>
    tpu.vector_store %arg9[%c0_68, %c0_69, %c0_70], %180 {strides = array<i32>} : memref<2x8x256xf32, #tpu.memory_space<vmem>>, vector<2x8x256xf32>,
    %182 = tpu.iota {dimensions = array<i32: 2>} : vector<1x1x256xi32>
    %c-1_i32_71 = arith.constant -1 : i32
    %183 = vector.broadcast %c-1_i32_71 : i32 to vector<1x1x256xi32>
    %184 = arith.addi %182, %183 : vector<1x1x256xi32>
    %c0_i32_72 = arith.constant 0 : i32
    %185 = vector.broadcast %c0_i32_72 : i32 to vector<1x1x256xi32>
    %186 = arith.cmpi sge, %184, %185 : vector<1x1x256xi32>
    %c-1_i32_73 = arith.constant -1 : i32
    %187 = vector.broadcast %c-1_i32_73 : i32 to vector<1x1x256xi32>
    %188 = arith.addi %182, %187 : vector<1x1x256xi32>
    %c256_i32_74 = arith.constant 256 : i32
    %189 = vector.broadcast %c256_i32_74 : i32 to vector<1x1x256xi32>
    %190 = arith.cmpi slt, %188, %189 : vector<1x1x256xi32>
    %191 = arith.andi %186, %190 : vector<1x1x256xi1>
    %c1_i32_75 = arith.constant 1 : i32
    %192 = vector.broadcast %c1_i32_75 : i32 to vector<1x1x256xi32>
    %193 = arith.addi %182, %192 : vector<1x1x256xi32>
    %c0_i32_76 = arith.constant 0 : i32
    %194 = vector.broadcast %c0_i32_76 : i32 to vector<1x1x256xi32>
    %195 = arith.cmpi sge, %193, %194 : vector<1x1x256xi32>
    %c1_i32_77 = arith.constant 1 : i32
    %196 = vector.broadcast %c1_i32_77 : i32 to vector<1x1x256xi32>
    %197 = arith.addi %182, %196 : vector<1x1x256xi32>
    %c256_i32_78 = arith.constant 256 : i32
    %198 = vector.broadcast %c256_i32_78 : i32 to vector<1x1x256xi32>
    %199 = arith.cmpi slt, %197, %198 : vector<1x1x256xi32>
    %200 = arith.andi %195, %199 : vector<1x1x256xi1>
    %cst_79 = arith.constant 0.000000e+00 : f32
    %201 = vector.broadcast %cst_79 : f32 to vector<2x8x256xf32>
    %c0_80 = arith.constant 0 : index
    %c0_81 = arith.constant 0 : index
    %c0_82 = arith.constant 0 : index
    %202 = vector.load %arg9[%c0_80, %c0_81, %c0_82] : memref<2x8x256xf32, #tpu.memory_space<vmem>>, vector<2x1x256xf32>
    %c1_i32_83 = arith.constant 1 : i32
    %203 = tpu.dynamic_rotate %202 by %c1_i32_83 dim 2 : vector<2x1x256xf32>, i32 -> vector<2x1x256xf32>
    %cst_84 = arith.constant 0.000000e+00 : f32
    %204 = vector.shape_cast %191 : vector<1x1x256xi1> to vector<1x1x256xi1>
    %205 = vector.broadcast %204 : vector<1x1x256xi1> to vector<2x1x256xi1>
    %206 = vector.broadcast %cst_84 : f32 to vector<2x1x256xf32>
    %207 = arith.select %205, %203, %206 : vector<2x1x256xi1>, vector<2x1x256xf32>
    %c0_85 = arith.constant 0 : index
    %c0_86 = arith.constant 0 : index
    %c0_87 = arith.constant 0 : index
    %208 = vector.load %arg4[%c0_85, %c0_86, %c0_87] : memref<24x8x1xf32, #tpu.memory_space<vmem>>, vector<1x8x1xf32>
    %209 = vector.shape_cast %208 : vector<1x8x1xf32> to vector<8x1xf32>
    %210 = vector.shape_cast %209 : vector<8x1xf32> to vector<1x8x1xf32>
    %211 = vector.broadcast %210 : vector<1x8x1xf32> to vector<2x8x256xf32>
    %212 = vector.broadcast %207 : vector<2x1x256xf32> to vector<2x8x256xf32>
    %213 = arith.mulf %211, %212 : vector<2x8x256xf32>
    %214 = arith.addf %201, %213 : vector<2x8x256xf32>
    %c1_88 = arith.constant 1 : index
    %c0_89 = arith.constant 0 : index
    %c0_90 = arith.constant 0 : index
    %215 = vector.load %arg4[%c1_88, %c0_89, %c0_90] : memref<24x8x1xf32, #tpu.memory_space<vmem>>, vector<1x8x1xf32>
    %216 = vector.shape_cast %215 : vector<1x8x1xf32> to vector<8x1xf32>
    %217 = vector.shape_cast %216 : vector<8x1xf32> to vector<1x8x1xf32>
    %218 = vector.broadcast %217 : vector<1x8x1xf32> to vector<2x8x256xf32>
    %219 = vector.broadcast %202 : vector<2x1x256xf32> to vector<2x8x256xf32>
    %220 = arith.mulf %218, %219 : vector<2x8x256xf32>
    %221 = arith.addf %214, %220 : vector<2x8x256xf32>
    %c255_i32_91 = arith.constant 255 : i32
    %222 = tpu.dynamic_rotate %202 by %c255_i32_91 dim 2 : vector<2x1x256xf32>, i32 -> vector<2x1x256xf32>
    %cst_92 = arith.constant 0.000000e+00 : f32
    %223 = vector.shape_cast %200 : vector<1x1x256xi1> to vector<1x1x256xi1>
    %224 = vector.broadcast %223 : vector<1x1x256xi1> to vector<2x1x256xi1>
    %225 = vector.broadcast %cst_92 : f32 to vector<2x1x256xf32>
    %226 = arith.select %224, %222, %225 : vector<2x1x256xi1>, vector<2x1x256xf32>
    %c2_93 = arith.constant 2 : index
    %c0_94 = arith.constant 0 : index
    %c0_95 = arith.constant 0 : index
    %227 = vector.load %arg4[%c2_93, %c0_94, %c0_95] : memref<24x8x1xf32, #tpu.memory_space<vmem>>, vector<1x8x1xf32>
    %228 = vector.shape_cast %227 : vector<1x8x1xf32> to vector<8x1xf32>
    %229 = vector.shape_cast %228 : vector<8x1xf32> to vector<1x8x1xf32>
    %230 = vector.broadcast %229 : vector<1x8x1xf32> to vector<2x8x256xf32>
    %231 = vector.broadcast %226 : vector<2x1x256xf32> to vector<2x8x256xf32>
    %232 = arith.mulf %230, %231 : vector<2x8x256xf32>
    %233 = arith.addf %221, %232 : vector<2x8x256xf32>
    %c0_96 = arith.constant 0 : index
    %c1_97 = arith.constant 1 : index
    %c0_98 = arith.constant 0 : index
    %234 = vector.load %arg9[%c0_96, %c1_97, %c0_98] : memref<2x8x256xf32, #tpu.memory_space<vmem>>, vector<2x1x256xf32>
    %c1_i32_99 = arith.constant 1 : i32
    %235 = tpu.dynamic_rotate %234 by %c1_i32_99 dim 2 : vector<2x1x256xf32>, i32 -> vector<2x1x256xf32>
    %cst_100 = arith.constant 0.000000e+00 : f32
    %236 = vector.shape_cast %191 : vector<1x1x256xi1> to vector<1x1x256xi1>
    %237 = vector.broadcast %236 : vector<1x1x256xi1> to vector<2x1x256xi1>
    %238 = vector.broadcast %cst_100 : f32 to vector<2x1x256xf32>
    %239 = arith.select %237, %235, %238 : vector<2x1x256xi1>, vector<2x1x256xf32>
    %c3_101 = arith.constant 3 : index
    %c0_102 = arith.constant 0 : index
    %c0_103 = arith.constant 0 : index
    %240 = vector.load %arg4[%c3_101, %c0_102, %c0_103] : memref<24x8x1xf32, #tpu.memory_space<vmem>>, vector<1x8x1xf32>
    %241 = vector.shape_cast %240 : vector<1x8x1xf32> to vector<8x1xf32>
    %242 = vector.shape_cast %241 : vector<8x1xf32> to vector<1x8x1xf32>
    %243 = vector.broadcast %242 : vector<1x8x1xf32> to vector<2x8x256xf32>
    %244 = vector.broadcast %239 : vector<2x1x256xf32> to vector<2x8x256xf32>
    %245 = arith.mulf %243, %244 : vector<2x8x256xf32>
    %246 = arith.addf %233, %245 : vector<2x8x256xf32>
    %c4_104 = arith.constant 4 : index
    %c0_105 = arith.constant 0 : index
    %c0_106 = arith.constant 0 : index
    %247 = vector.load %arg4[%c4_104, %c0_105, %c0_106] : memref<24x8x1xf32, #tpu.memory_space<vmem>>, vector<1x8x1xf32>
    %248 = vector.shape_cast %247 : vector<1x8x1xf32> to vector<8x1xf32>
    %249 = vector.shape_cast %248 : vector<8x1xf32> to vector<1x8x1xf32>
    %250 = vector.broadcast %249 : vector<1x8x1xf32> to vector<2x8x256xf32>
    %251 = vector.broadcast %234 : vector<2x1x256xf32> to vector<2x8x256xf32>
    %252 = arith.mulf %250, %251 : vector<2x8x256xf32>
    %253 = arith.addf %246, %252 : vector<2x8x256xf32>
    %c255_i32_107 = arith.constant 255 : i32
    %254 = tpu.dynamic_rotate %234 by %c255_i32_107 dim 2 : vector<2x1x256xf32>, i32 -> vector<2x1x256xf32>
    %cst_108 = arith.constant 0.000000e+00 : f32
    %255 = vector.shape_cast %200 : vector<1x1x256xi1> to vector<1x1x256xi1>
    %256 = vector.broadcast %255 : vector<1x1x256xi1> to vector<2x1x256xi1>
    %257 = vector.broadcast %cst_108 : f32 to vector<2x1x256xf32>
    %258 = arith.select %256, %254, %257 : vector<2x1x256xi1>, vector<2x1x256xf32>
    %c5_109 = arith.constant 5 : index
    %c0_110 = arith.constant 0 : index
    %c0_111 = arith.constant 0 : index
    %259 = vector.load %arg4[%c5_109, %c0_110, %c0_111] : memref<24x8x1xf32, #tpu.memory_space<vmem>>, vector<1x8x1xf32>
    %260 = vector.shape_cast %259 : vector<1x8x1xf32> to vector<8x1xf32>
    %261 = vector.shape_cast %260 : vector<8x1xf32> to vector<1x8x1xf32>
    %262 = vector.broadcast %261 : vector<1x8x1xf32> to vector<2x8x256xf32>
    %263 = vector.broadcast %258 : vector<2x1x256xf32> to vector<2x8x256xf32>
    %264 = arith.mulf %262, %263 : vector<2x8x256xf32>
    %265 = arith.addf %253, %264 : vector<2x8x256xf32>
    %c0_112 = arith.constant 0 : index
    %c2_113 = arith.constant 2 : index
    %c0_114 = arith.constant 0 : index
    %266 = vector.load %arg9[%c0_112, %c2_113, %c0_114] : memref<2x8x256xf32, #tpu.memory_space<vmem>>, vector<2x1x256xf32>
    %c1_i32_115 = arith.constant 1 : i32
    %267 = tpu.dynamic_rotate %266 by %c1_i32_115 dim 2 : vector<2x1x256xf32>, i32 -> vector<2x1x256xf32>
    %cst_116 = arith.constant 0.000000e+00 : f32
    %268 = vector.shape_cast %191 : vector<1x1x256xi1> to vector<1x1x256xi1>
    %269 = vector.broadcast %268 : vector<1x1x256xi1> to vector<2x1x256xi1>
    %270 = vector.broadcast %cst_116 : f32 to vector<2x1x256xf32>
    %271 = arith.select %269, %267, %270 : vector<2x1x256xi1>, vector<2x1x256xf32>
    %c6_117 = arith.constant 6 : index
    %c0_118 = arith.constant 0 : index
    %c0_119 = arith.constant 0 : index
    %272 = vector.load %arg4[%c6_117, %c0_118, %c0_119] : memref<24x8x1xf32, #tpu.memory_space<vmem>>, vector<1x8x1xf32>
    %273 = vector.shape_cast %272 : vector<1x8x1xf32> to vector<8x1xf32>
    %274 = vector.shape_cast %273 : vector<8x1xf32> to vector<1x8x1xf32>
    %275 = vector.broadcast %274 : vector<1x8x1xf32> to vector<2x8x256xf32>
    %276 = vector.broadcast %271 : vector<2x1x256xf32> to vector<2x8x256xf32>
    %277 = arith.mulf %275, %276 : vector<2x8x256xf32>
    %278 = arith.addf %265, %277 : vector<2x8x256xf32>
    %c7_120 = arith.constant 7 : index
    %c0_121 = arith.constant 0 : index
    %c0_122 = arith.constant 0 : index
    %279 = vector.load %arg4[%c7_120, %c0_121, %c0_122] : memref<24x8x1xf32, #tpu.memory_space<vmem>>, vector<1x8x1xf32>
    %280 = vector.shape_cast %279 : vector<1x8x1xf32> to vector<8x1xf32>
    %281 = vector.shape_cast %280 : vector<8x1xf32> to vector<1x8x1xf32>
    %282 = vector.broadcast %281 : vector<1x8x1xf32> to vector<2x8x256xf32>
    %283 = vector.broadcast %266 : vector<2x1x256xf32> to vector<2x8x256xf32>
    %284 = arith.mulf %282, %283 : vector<2x8x256xf32>
    %285 = arith.addf %278, %284 : vector<2x8x256xf32>
    %c255_i32_123 = arith.constant 255 : i32
    %286 = tpu.dynamic_rotate %266 by %c255_i32_123 dim 2 : vector<2x1x256xf32>, i32 -> vector<2x1x256xf32>
    %cst_124 = arith.constant 0.000000e+00 : f32
    %287 = vector.shape_cast %200 : vector<1x1x256xi1> to vector<1x1x256xi1>
    %288 = vector.broadcast %287 : vector<1x1x256xi1> to vector<2x1x256xi1>
    %289 = vector.broadcast %cst_124 : f32 to vector<2x1x256xf32>
    %290 = arith.select %288, %286, %289 : vector<2x1x256xi1>, vector<2x1x256xf32>
    %c8_125 = arith.constant 8 : index
    %c0_126 = arith.constant 0 : index
    %c0_127 = arith.constant 0 : index
    %291 = vector.load %arg4[%c8_125, %c0_126, %c0_127] : memref<24x8x1xf32, #tpu.memory_space<vmem>>, vector<1x8x1xf32>
    %292 = vector.shape_cast %291 : vector<1x8x1xf32> to vector<8x1xf32>
    %293 = vector.shape_cast %292 : vector<8x1xf32> to vector<1x8x1xf32>
    %294 = vector.broadcast %293 : vector<1x8x1xf32> to vector<2x8x256xf32>
    %295 = vector.broadcast %290 : vector<2x1x256xf32> to vector<2x8x256xf32>
    %296 = arith.mulf %294, %295 : vector<2x8x256xf32>
    %297 = arith.addf %285, %296 : vector<2x8x256xf32>
    %c0_128 = arith.constant 0 : index
    %c3_129 = arith.constant 3 : index
    %c0_130 = arith.constant 0 : index
    %298 = vector.load %arg9[%c0_128, %c3_129, %c0_130] : memref<2x8x256xf32, #tpu.memory_space<vmem>>, vector<2x1x256xf32>
    %c1_i32_131 = arith.constant 1 : i32
    %299 = tpu.dynamic_rotate %298 by %c1_i32_131 dim 2 : vector<2x1x256xf32>, i32 -> vector<2x1x256xf32>
    %cst_132 = arith.constant 0.000000e+00 : f32
    %300 = vector.shape_cast %191 : vector<1x1x256xi1> to vector<1x1x256xi1>
    %301 = vector.broadcast %300 : vector<1x1x256xi1> to vector<2x1x256xi1>
    %302 = vector.broadcast %cst_132 : f32 to vector<2x1x256xf32>
    %303 = arith.select %301, %299, %302 : vector<2x1x256xi1>, vector<2x1x256xf32>
    %c9_133 = arith.constant 9 : index
    %c0_134 = arith.constant 0 : index
    %c0_135 = arith.constant 0 : index
    %304 = vector.load %arg4[%c9_133, %c0_134, %c0_135] : memref<24x8x1xf32, #tpu.memory_space<vmem>>, vector<1x8x1xf32>
    %305 = vector.shape_cast %304 : vector<1x8x1xf32> to vector<8x1xf32>
    %306 = vector.shape_cast %305 : vector<8x1xf32> to vector<1x8x1xf32>
    %307 = vector.broadcast %306 : vector<1x8x1xf32> to vector<2x8x256xf32>
    %308 = vector.broadcast %303 : vector<2x1x256xf32> to vector<2x8x256xf32>
    %309 = arith.mulf %307, %308 : vector<2x8x256xf32>
    %310 = arith.addf %297, %309 : vector<2x8x256xf32>
    %c10_136 = arith.constant 10 : index
    %c0_137 = arith.constant 0 : index
    %c0_138 = arith.constant 0 : index
    %311 = vector.load %arg4[%c10_136, %c0_137, %c0_138] : memref<24x8x1xf32, #tpu.memory_space<vmem>>, vector<1x8x1xf32>
    %312 = vector.shape_cast %311 : vector<1x8x1xf32> to vector<8x1xf32>
    %313 = vector.shape_cast %312 : vector<8x1xf32> to vector<1x8x1xf32>
    %314 = vector.broadcast %313 : vector<1x8x1xf32> to vector<2x8x256xf32>
    %315 = vector.broadcast %298 : vector<2x1x256xf32> to vector<2x8x256xf32>
    %316 = arith.mulf %314, %315 : vector<2x8x256xf32>
    %317 = arith.addf %310, %316 : vector<2x8x256xf32>
    %c255_i32_139 = arith.constant 255 : i32
    %318 = tpu.dynamic_rotate %298 by %c255_i32_139 dim 2 : vector<2x1x256xf32>, i32 -> vector<2x1x256xf32>
    %cst_140 = arith.constant 0.000000e+00 : f32
    %319 = vector.shape_cast %200 : vector<1x1x256xi1> to vector<1x1x256xi1>
    %320 = vector.broadcast %319 : vector<1x1x256xi1> to vector<2x1x256xi1>
    %321 = vector.broadcast %cst_140 : f32 to vector<2x1x256xf32>
    %322 = arith.select %320, %318, %321 : vector<2x1x256xi1>, vector<2x1x256xf32>
    %c11_141 = arith.constant 11 : index
    %c0_142 = arith.constant 0 : index
    %c0_143 = arith.constant 0 : index
    %323 = vector.load %arg4[%c11_141, %c0_142, %c0_143] : memref<24x8x1xf32, #tpu.memory_space<vmem>>, vector<1x8x1xf32>
    %324 = vector.shape_cast %323 : vector<1x8x1xf32> to vector<8x1xf32>
    %325 = vector.shape_cast %324 : vector<8x1xf32> to vector<1x8x1xf32>
    %326 = vector.broadcast %325 : vector<1x8x1xf32> to vector<2x8x256xf32>
    %327 = vector.broadcast %322 : vector<2x1x256xf32> to vector<2x8x256xf32>
    %328 = arith.mulf %326, %327 : vector<2x8x256xf32>
    %329 = arith.addf %317, %328 : vector<2x8x256xf32>
    %c0_144 = arith.constant 0 : index
    %c4_145 = arith.constant 4 : index
    %c0_146 = arith.constant 0 : index
    %330 = vector.load %arg9[%c0_144, %c4_145, %c0_146] : memref<2x8x256xf32, #tpu.memory_space<vmem>>, vector<2x1x256xf32>
    %c1_i32_147 = arith.constant 1 : i32
    %331 = tpu.dynamic_rotate %330 by %c1_i32_147 dim 2 : vector<2x1x256xf32>, i32 -> vector<2x1x256xf32>
    %cst_148 = arith.constant 0.000000e+00 : f32
    %332 = vector.shape_cast %191 : vector<1x1x256xi1> to vector<1x1x256xi1>
    %333 = vector.broadcast %332 : vector<1x1x256xi1> to vector<2x1x256xi1>
    %334 = vector.broadcast %cst_148 : f32 to vector<2x1x256xf32>
    %335 = arith.select %333, %331, %334 : vector<2x1x256xi1>, vector<2x1x256xf32>
    %c12 = arith.constant 12 : index
    %c0_149 = arith.constant 0 : index
    %c0_150 = arith.constant 0 : index
    %336 = vector.load %arg4[%c12, %c0_149, %c0_150] : memref<24x8x1xf32, #tpu.memory_space<vmem>>, vector<1x8x1xf32>
    %337 = vector.shape_cast %336 : vector<1x8x1xf32> to vector<8x1xf32>
    %338 = vector.shape_cast %337 : vector<8x1xf32> to vector<1x8x1xf32>
    %339 = vector.broadcast %338 : vector<1x8x1xf32> to vector<2x8x256xf32>
    %340 = vector.broadcast %335 : vector<2x1x256xf32> to vector<2x8x256xf32>
    %341 = arith.mulf %339, %340 : vector<2x8x256xf32>
    %342 = arith.addf %329, %341 : vector<2x8x256xf32>
    %c13 = arith.constant 13 : index
    %c0_151 = arith.constant 0 : index
    %c0_152 = arith.constant 0 : index
    %343 = vector.load %arg4[%c13, %c0_151, %c0_152] : memref<24x8x1xf32, #tpu.memory_space<vmem>>, vector<1x8x1xf32>
    %344 = vector.shape_cast %343 : vector<1x8x1xf32> to vector<8x1xf32>
    %345 = vector.shape_cast %344 : vector<8x1xf32> to vector<1x8x1xf32>
    %346 = vector.broadcast %345 : vector<1x8x1xf32> to vector<2x8x256xf32>
    %347 = vector.broadcast %330 : vector<2x1x256xf32> to vector<2x8x256xf32>
    %348 = arith.mulf %346, %347 : vector<2x8x256xf32>
    %349 = arith.addf %342, %348 : vector<2x8x256xf32>
    %c255_i32_153 = arith.constant 255 : i32
    %350 = tpu.dynamic_rotate %330 by %c255_i32_153 dim 2 : vector<2x1x256xf32>, i32 -> vector<2x1x256xf32>
    %cst_154 = arith.constant 0.000000e+00 : f32
    %351 = vector.shape_cast %200 : vector<1x1x256xi1> to vector<1x1x256xi1>
    %352 = vector.broadcast %351 : vector<1x1x256xi1> to vector<2x1x256xi1>
    %353 = vector.broadcast %cst_154 : f32 to vector<2x1x256xf32>
    %354 = arith.select %352, %350, %353 : vector<2x1x256xi1>, vector<2x1x256xf32>
    %c14 = arith.constant 14 : index
    %c0_155 = arith.constant 0 : index
    %c0_156 = arith.constant 0 : index
    %355 = vector.load %arg4[%c14, %c0_155, %c0_156] : memref<24x8x1xf32, #tpu.memory_space<vmem>>, vector<1x8x1xf32>
    %356 = vector.shape_cast %355 : vector<1x8x1xf32> to vector<8x1xf32>
    %357 = vector.shape_cast %356 : vector<8x1xf32> to vector<1x8x1xf32>
    %358 = vector.broadcast %357 : vector<1x8x1xf32> to vector<2x8x256xf32>
    %359 = vector.broadcast %354 : vector<2x1x256xf32> to vector<2x8x256xf32>
    %360 = arith.mulf %358, %359 : vector<2x8x256xf32>
    %361 = arith.addf %349, %360 : vector<2x8x256xf32>
    %c0_157 = arith.constant 0 : index
    %c5_158 = arith.constant 5 : index
    %c0_159 = arith.constant 0 : index
    %362 = vector.load %arg9[%c0_157, %c5_158, %c0_159] : memref<2x8x256xf32, #tpu.memory_space<vmem>>, vector<2x1x256xf32>
    %c1_i32_160 = arith.constant 1 : i32
    %363 = tpu.dynamic_rotate %362 by %c1_i32_160 dim 2 : vector<2x1x256xf32>, i32 -> vector<2x1x256xf32>
    %cst_161 = arith.constant 0.000000e+00 : f32
    %364 = vector.shape_cast %191 : vector<1x1x256xi1> to vector<1x1x256xi1>
    %365 = vector.broadcast %364 : vector<1x1x256xi1> to vector<2x1x256xi1>
    %366 = vector.broadcast %cst_161 : f32 to vector<2x1x256xf32>
    %367 = arith.select %365, %363, %366 : vector<2x1x256xi1>, vector<2x1x256xf32>
    %c15 = arith.constant 15 : index
    %c0_162 = arith.constant 0 : index
    %c0_163 = arith.constant 0 : index
    %368 = vector.load %arg4[%c15, %c0_162, %c0_163] : memref<24x8x1xf32, #tpu.memory_space<vmem>>, vector<1x8x1xf32>
    %369 = vector.shape_cast %368 : vector<1x8x1xf32> to vector<8x1xf32>
    %370 = vector.shape_cast %369 : vector<8x1xf32> to vector<1x8x1xf32>
    %371 = vector.broadcast %370 : vector<1x8x1xf32> to vector<2x8x256xf32>
    %372 = vector.broadcast %367 : vector<2x1x256xf32> to vector<2x8x256xf32>
    %373 = arith.mulf %371, %372 : vector<2x8x256xf32>
    %374 = arith.addf %361, %373 : vector<2x8x256xf32>
    %c16 = arith.constant 16 : index
    %c0_164 = arith.constant 0 : index
    %c0_165 = arith.constant 0 : index
    %375 = vector.load %arg4[%c16, %c0_164, %c0_165] : memref<24x8x1xf32, #tpu.memory_space<vmem>>, vector<1x8x1xf32>
    %376 = vector.shape_cast %375 : vector<1x8x1xf32> to vector<8x1xf32>
    %377 = vector.shape_cast %376 : vector<8x1xf32> to vector<1x8x1xf32>
    %378 = vector.broadcast %377 : vector<1x8x1xf32> to vector<2x8x256xf32>
    %379 = vector.broadcast %362 : vector<2x1x256xf32> to vector<2x8x256xf32>
    %380 = arith.mulf %378, %379 : vector<2x8x256xf32>
    %381 = arith.addf %374, %380 : vector<2x8x256xf32>
    %c255_i32_166 = arith.constant 255 : i32
    %382 = tpu.dynamic_rotate %362 by %c255_i32_166 dim 2 : vector<2x1x256xf32>, i32 -> vector<2x1x256xf32>
    %cst_167 = arith.constant 0.000000e+00 : f32
    %383 = vector.shape_cast %200 : vector<1x1x256xi1> to vector<1x1x256xi1>
    %384 = vector.broadcast %383 : vector<1x1x256xi1> to vector<2x1x256xi1>
    %385 = vector.broadcast %cst_167 : f32 to vector<2x1x256xf32>
    %386 = arith.select %384, %382, %385 : vector<2x1x256xi1>, vector<2x1x256xf32>
    %c17 = arith.constant 17 : index
    %c0_168 = arith.constant 0 : index
    %c0_169 = arith.constant 0 : index
    %387 = vector.load %arg4[%c17, %c0_168, %c0_169] : memref<24x8x1xf32, #tpu.memory_space<vmem>>, vector<1x8x1xf32>
    %388 = vector.shape_cast %387 : vector<1x8x1xf32> to vector<8x1xf32>
    %389 = vector.shape_cast %388 : vector<8x1xf32> to vector<1x8x1xf32>
    %390 = vector.broadcast %389 : vector<1x8x1xf32> to vector<2x8x256xf32>
    %391 = vector.broadcast %386 : vector<2x1x256xf32> to vector<2x8x256xf32>
    %392 = arith.mulf %390, %391 : vector<2x8x256xf32>
    %393 = arith.addf %381, %392 : vector<2x8x256xf32>
    %c0_170 = arith.constant 0 : index
    %c6_171 = arith.constant 6 : index
    %c0_172 = arith.constant 0 : index
    %394 = vector.load %arg9[%c0_170, %c6_171, %c0_172] : memref<2x8x256xf32, #tpu.memory_space<vmem>>, vector<2x1x256xf32>
    %c1_i32_173 = arith.constant 1 : i32
    %395 = tpu.dynamic_rotate %394 by %c1_i32_173 dim 2 : vector<2x1x256xf32>, i32 -> vector<2x1x256xf32>
    %cst_174 = arith.constant 0.000000e+00 : f32
    %396 = vector.shape_cast %191 : vector<1x1x256xi1> to vector<1x1x256xi1>
    %397 = vector.broadcast %396 : vector<1x1x256xi1> to vector<2x1x256xi1>
    %398 = vector.broadcast %cst_174 : f32 to vector<2x1x256xf32>
    %399 = arith.select %397, %395, %398 : vector<2x1x256xi1>, vector<2x1x256xf32>
    %c18 = arith.constant 18 : index
    %c0_175 = arith.constant 0 : index
    %c0_176 = arith.constant 0 : index
    %400 = vector.load %arg4[%c18, %c0_175, %c0_176] : memref<24x8x1xf32, #tpu.memory_space<vmem>>, vector<1x8x1xf32>
    %401 = vector.shape_cast %400 : vector<1x8x1xf32> to vector<8x1xf32>
    %402 = vector.shape_cast %401 : vector<8x1xf32> to vector<1x8x1xf32>
    %403 = vector.broadcast %402 : vector<1x8x1xf32> to vector<2x8x256xf32>
    %404 = vector.broadcast %399 : vector<2x1x256xf32> to vector<2x8x256xf32>
    %405 = arith.mulf %403, %404 : vector<2x8x256xf32>
    %406 = arith.addf %393, %405 : vector<2x8x256xf32>
    %c19 = arith.constant 19 : index
    %c0_177 = arith.constant 0 : index
    %c0_178 = arith.constant 0 : index
    %407 = vector.load %arg4[%c19, %c0_177, %c0_178] : memref<24x8x1xf32, #tpu.memory_space<vmem>>, vector<1x8x1xf32>
    %408 = vector.shape_cast %407 : vector<1x8x1xf32> to vector<8x1xf32>
    %409 = vector.shape_cast %408 : vector<8x1xf32> to vector<1x8x1xf32>
    %410 = vector.broadcast %409 : vector<1x8x1xf32> to vector<2x8x256xf32>
    %411 = vector.broadcast %394 : vector<2x1x256xf32> to vector<2x8x256xf32>
    %412 = arith.mulf %410, %411 : vector<2x8x256xf32>
    %413 = arith.addf %406, %412 : vector<2x8x256xf32>
    %c255_i32_179 = arith.constant 255 : i32
    %414 = tpu.dynamic_rotate %394 by %c255_i32_179 dim 2 : vector<2x1x256xf32>, i32 -> vector<2x1x256xf32>
    %cst_180 = arith.constant 0.000000e+00 : f32
    %415 = vector.shape_cast %200 : vector<1x1x256xi1> to vector<1x1x256xi1>
    %416 = vector.broadcast %415 : vector<1x1x256xi1> to vector<2x1x256xi1>
    %417 = vector.broadcast %cst_180 : f32 to vector<2x1x256xf32>
    %418 = arith.select %416, %414, %417 : vector<2x1x256xi1>, vector<2x1x256xf32>
    %c20 = arith.constant 20 : index
    %c0_181 = arith.constant 0 : index
    %c0_182 = arith.constant 0 : index
    %419 = vector.load %arg4[%c20, %c0_181, %c0_182] : memref<24x8x1xf32, #tpu.memory_space<vmem>>, vector<1x8x1xf32>
    %420 = vector.shape_cast %419 : vector<1x8x1xf32> to vector<8x1xf32>
    %421 = vector.shape_cast %420 : vector<8x1xf32> to vector<1x8x1xf32>
    %422 = vector.broadcast %421 : vector<1x8x1xf32> to vector<2x8x256xf32>
    %423 = vector.broadcast %418 : vector<2x1x256xf32> to vector<2x8x256xf32>
    %424 = arith.mulf %422, %423 : vector<2x8x256xf32>
    %425 = arith.addf %413, %424 : vector<2x8x256xf32>
    %c0_183 = arith.constant 0 : index
    %c7_184 = arith.constant 7 : index
    %c0_185 = arith.constant 0 : index
    %426 = vector.load %arg9[%c0_183, %c7_184, %c0_185] : memref<2x8x256xf32, #tpu.memory_space<vmem>>, vector<2x1x256xf32>
    %c1_i32_186 = arith.constant 1 : i32
    %427 = tpu.dynamic_rotate %426 by %c1_i32_186 dim 2 : vector<2x1x256xf32>, i32 -> vector<2x1x256xf32>
    %cst_187 = arith.constant 0.000000e+00 : f32
    %428 = vector.shape_cast %191 : vector<1x1x256xi1> to vector<1x1x256xi1>
    %429 = vector.broadcast %428 : vector<1x1x256xi1> to vector<2x1x256xi1>
    %430 = vector.broadcast %cst_187 : f32 to vector<2x1x256xf32>
    %431 = arith.select %429, %427, %430 : vector<2x1x256xi1>, vector<2x1x256xf32>
    %c21 = arith.constant 21 : index
    %c0_188 = arith.constant 0 : index
    %c0_189 = arith.constant 0 : index
    %432 = vector.load %arg4[%c21, %c0_188, %c0_189] : memref<24x8x1xf32, #tpu.memory_space<vmem>>, vector<1x8x1xf32>
    %433 = vector.shape_cast %432 : vector<1x8x1xf32> to vector<8x1xf32>
    %434 = vector.shape_cast %433 : vector<8x1xf32> to vector<1x8x1xf32>
    %435 = vector.broadcast %434 : vector<1x8x1xf32> to vector<2x8x256xf32>
    %436 = vector.broadcast %431 : vector<2x1x256xf32> to vector<2x8x256xf32>
    %437 = arith.mulf %435, %436 : vector<2x8x256xf32>
    %438 = arith.addf %425, %437 : vector<2x8x256xf32>
    %c22 = arith.constant 22 : index
    %c0_190 = arith.constant 0 : index
    %c0_191 = arith.constant 0 : index
    %439 = vector.load %arg4[%c22, %c0_190, %c0_191] : memref<24x8x1xf32, #tpu.memory_space<vmem>>, vector<1x8x1xf32>
    %440 = vector.shape_cast %439 : vector<1x8x1xf32> to vector<8x1xf32>
    %441 = vector.shape_cast %440 : vector<8x1xf32> to vector<1x8x1xf32>
    %442 = vector.broadcast %441 : vector<1x8x1xf32> to vector<2x8x256xf32>
    %443 = vector.broadcast %426 : vector<2x1x256xf32> to vector<2x8x256xf32>
    %444 = arith.mulf %442, %443 : vector<2x8x256xf32>
    %445 = arith.addf %438, %444 : vector<2x8x256xf32>
    %c255_i32_192 = arith.constant 255 : i32
    %446 = tpu.dynamic_rotate %426 by %c255_i32_192 dim 2 : vector<2x1x256xf32>, i32 -> vector<2x1x256xf32>
    %cst_193 = arith.constant 0.000000e+00 : f32
    %447 = vector.shape_cast %200 : vector<1x1x256xi1> to vector<1x1x256xi1>
    %448 = vector.broadcast %447 : vector<1x1x256xi1> to vector<2x1x256xi1>
    %449 = vector.broadcast %cst_193 : f32 to vector<2x1x256xf32>
    %450 = arith.select %448, %446, %449 : vector<2x1x256xi1>, vector<2x1x256xf32>
    %c23 = arith.constant 23 : index
    %c0_194 = arith.constant 0 : index
    %c0_195 = arith.constant 0 : index
    %451 = vector.load %arg4[%c23, %c0_194, %c0_195] : memref<24x8x1xf32, #tpu.memory_space<vmem>>, vector<1x8x1xf32>
    %452 = vector.shape_cast %451 : vector<1x8x1xf32> to vector<8x1xf32>
    %453 = vector.shape_cast %452 : vector<8x1xf32> to vector<1x8x1xf32>
    %454 = vector.broadcast %453 : vector<1x8x1xf32> to vector<2x8x256xf32>
    %455 = vector.broadcast %450 : vector<2x1x256xf32> to vector<2x8x256xf32>
    %456 = arith.mulf %454, %455 : vector<2x8x256xf32>
    %457 = arith.addf %445, %456 : vector<2x8x256xf32>
    %cst_196 = arith.constant dense<0.000000e+00> : vector<2x8xf32>
    %458 = vector.multi_reduction <add>, %457, %cst_196 [2] : vector<2x8x256xf32> to vector<2x8xf32>
    %459 = vector.shape_cast %458 : vector<2x8xf32> to vector<2x8x1xf32>
    %cst_197 = arith.constant dense<0.000000e+00> : vector<8x1xf32>
    %460 = vector.multi_reduction <add>, %459, %cst_197 [0] : vector<2x8x1xf32> to vector<8x1xf32>
    %461 = vector.shape_cast %460 : vector<8x1xf32> to vector<1x8x1xf32>
    %462 = arith.mulf %457, %457 : vector<2x8x256xf32>
    %cst_198 = arith.constant dense<0.000000e+00> : vector<2x8xf32>
    %463 = vector.multi_reduction <add>, %462, %cst_198 [2] : vector<2x8x256xf32> to vector<2x8xf32>
    %464 = vector.shape_cast %463 : vector<2x8xf32> to vector<2x8x1xf32>
    %cst_199 = arith.constant dense<0.000000e+00> : vector<8x1xf32>
    %465 = vector.multi_reduction <add>, %464, %cst_199 [0] : vector<2x8x1xf32> to vector<8x1xf32>
    %466 = vector.shape_cast %465 : vector<8x1xf32> to vector<1x8x1xf32>
    %cst_200 = arith.constant 0.001953125 : f32
    %467 = vector.broadcast %cst_200 : f32 to vector<1x8x1xf32>
    %468 = arith.mulf %461, %467 : vector<1x8x1xf32>
    %cst_201 = arith.constant 0.001953125 : f32
    %469 = vector.broadcast %cst_201 : f32 to vector<1x8x1xf32>
    %470 = arith.mulf %466, %469 : vector<1x8x1xf32>
    %471 = arith.mulf %468, %468 : vector<1x8x1xf32>
    %472 = arith.subf %470, %471 : vector<1x8x1xf32>
    %cst_202 = arith.constant 0.000000e+00 : f32
    %473 = vector.broadcast %cst_202 : f32 to vector<1x8x1xf32>
    %474 = arith.maximumf %472, %473 : vector<1x8x1xf32>
    %cst_203 = arith.constant 9.99999974E-6 : f32
    %475 = vector.broadcast %cst_203 : f32 to vector<1x8x1xf32>
    %476 = arith.addf %474, %475 : vector<1x8x1xf32>
    %477 = math.rsqrt %476 : vector<1x8x1xf32>
    %c0_204 = arith.constant 0 : index
    %c0_205 = arith.constant 0 : index
    %478 = vector.load %arg5[%c0_204, %c0_205] : memref<8x1xf32, #tpu.memory_space<vmem>>, vector<8x1xf32>
    %479 = vector.shape_cast %478 : vector<8x1xf32> to vector<1x8x1xf32>
    %480 = arith.mulf %479, %477 : vector<1x8x1xf32>
    %c0_206 = arith.constant 0 : index
    %c0_207 = arith.constant 0 : index
    %481 = vector.load %arg6[%c0_206, %c0_207] : memref<8x1xf32, #tpu.memory_space<vmem>>, vector<8x1xf32>
    %482 = arith.mulf %468, %480 : vector<1x8x1xf32>
    %483 = vector.shape_cast %481 : vector<8x1xf32> to vector<1x8x1xf32>
    %484 = arith.subf %483, %482 : vector<1x8x1xf32>
    %485 = vector.broadcast %480 : vector<1x8x1xf32> to vector<2x8x256xf32>
    %486 = arith.mulf %457, %485 : vector<2x8x256xf32>
    %487 = vector.broadcast %484 : vector<1x8x1xf32> to vector<2x8x256xf32>
    %488 = arith.addf %486, %487 : vector<2x8x256xf32>
    %cst_208 = arith.constant 0.000000e+00 : f32
    %489 = vector.broadcast %cst_208 : f32 to vector<2x8x256xf32>
    %490 = arith.maximumf %488, %489 : vector<2x8x256xf32>
    %c0_209 = arith.constant 0 : index
    %c0_210 = arith.constant 0 : index
    %c0_211 = arith.constant 0 : index
    %491 = vector.load %arg7[%c0_209, %c0_210, %c0_211] : memref<2x8x256xf32, #tpu.memory_space<vmem>>, vector<2x8x256xf32>
    tpu.vector_store %arg7[%c0_209, %c0_210, %c0_211], %490 {strides = array<i32>} : memref<2x8x256xf32, #tpu.memory_space<vmem>>, vector<2x8x256xf32>,
    %c255_i32_212 = arith.constant 255 : i32
    %492 = tpu.dynamic_rotate %490 by %c255_i32_212 dim 2 : vector<2x8x256xf32>, i32 -> vector<2x8x256xf32>
    %493 = arith.maximumf %490, %492 : vector<2x8x256xf32>
    %494 = tpu.iota {dimensions = array<i32: 0>} : vector<256x128xi32>
    %495 = tpu.iota {dimensions = array<i32: 1>} : vector<256x128xi32>
    %c2_i32 = arith.constant 2 : i32
    %496 = vector.broadcast %c2_i32 : i32 to vector<256x128xi32>
    %497 = arith.muli %496, %495 : vector<256x128xi32>
    %498 = arith.cmpi eq, %494, %497 : vector<256x128xi32>
    %cst_213 = arith.constant 1.000000e+00 : f32
    %cst_214 = arith.constant 0.000000e+00 : f32
    %499 = vector.broadcast %cst_213 : f32 to vector<256x128xf32>
    %500 = vector.broadcast %cst_214 : f32 to vector<256x128xf32>
    %501 = arith.select %498, %499, %500 : vector<256x128xi1>, vector<256x128xf32>
    %502 = vector.extract_strided_slice %493 {offsets = [0, 0, 0], sizes = [1, 8, 256], strides = [1, 1, 1]} : vector<2x8x256xf32> to vector<1x8x256xf32>
    %503 = vector.shape_cast %502 : vector<1x8x256xf32> to vector<8x256xf32>
    %cst_215 = arith.constant dense<0.000000e+00> : vector<8x128xf32>
    %504 = tpu.matmul %503, %501, %cst_215 {dimension_numbers = #tpu.dot_dimension_numbers<[1], [0], [0], [1], [0, 0, 1, 1], [], []>} : vector<8x256xf32>, vector<256x128xf32>, vector<8x128xf32> -> vector<8x128xf32>
    %c0_216 = arith.constant 0 : index
    %c0_217 = arith.constant 0 : index
    %c0_218 = arith.constant 0 : index
    %505 = vector.load %arg8[%c0_216, %c0_217, %c0_218] : memref<2x8x128xf32, #tpu.memory_space<vmem>>, vector<1x8x128xf32>
    %506 = vector.shape_cast %505 : vector<1x8x128xf32> to vector<8x128xf32>
    %507 = vector.shape_cast %504 : vector<8x128xf32> to vector<1x8x128xf32>
    tpu.vector_store %arg8[%c0_216, %c0_217, %c0_218], %507 {strides = array<i32>} : memref<2x8x128xf32, #tpu.memory_space<vmem>>, vector<1x8x128xf32>,
    %508 = vector.extract_strided_slice %493 {offsets = [1, 0, 0], sizes = [1, 8, 256], strides = [1, 1, 1]} : vector<2x8x256xf32> to vector<1x8x256xf32>
    %509 = vector.shape_cast %508 : vector<1x8x256xf32> to vector<8x256xf32>
    %cst_219 = arith.constant dense<0.000000e+00> : vector<8x128xf32>
    %510 = tpu.matmul %509, %501, %cst_219 {dimension_numbers = #tpu.dot_dimension_numbers<[1], [0], [0], [1], [0, 0, 1, 1], [], []>} : vector<8x256xf32>, vector<256x128xf32>, vector<8x128xf32> -> vector<8x128xf32>
    %c1_220 = arith.constant 1 : index
    %c0_221 = arith.constant 0 : index
    %c0_222 = arith.constant 0 : index
    %511 = vector.load %arg8[%c1_220, %c0_221, %c0_222] : memref<2x8x128xf32, #tpu.memory_space<vmem>>, vector<1x8x128xf32>
    %512 = vector.shape_cast %511 : vector<1x8x128xf32> to vector<8x128xf32>
    %513 = vector.shape_cast %510 : vector<8x128xf32> to vector<1x8x128xf32>
    tpu.vector_store %arg8[%c1_220, %c0_221, %c0_222], %513 {strides = array<i32>} : memref<2x8x128xf32, #tpu.memory_space<vmem>>, vector<1x8x128xf32>,
    return
  }
}

</mosaic_0001>

<bundles_post_ra>
// kernel: tpu_custom_call.1
= control target key start
LH: loop header
LB: loop body
LE: loop exit
PB: predicated region body
PF: predicated region fallthrough
CT: control target
= control target key end

     0   :  { %14 = vsyncpa [#allocation4], 0  ;;  %v1790_v2 = vmov 0   ;;  %s1791_s9 = smov 1   ;;  %s3149_s0 = inlined_call_operand.vmem [shape: f32[2,4,256], index: 0, kind: input, shape index: {}]   ;;  %s3150_s1 = inlined_call_operand.vmem [shape: f32[12,8,1], index: 1, kind: input, shape index: {}]   ;;  %s3151_s2 = inlined_call_operand.vmem [shape: f32[8,1], index: 2, kind: input, shape index: {}]   ;;  %s3152_s3 = inlined_call_operand.vmem [shape: f32[8,1], index: 3, kind: input, shape index: {}]   ;;  %s3153_s4 = inlined_call_operand.vmem [shape: f32[24,8,1], index: 4, kind: input, shape index: {}]   ;;  %s3154_s5 = inlined_call_operand.vmem [shape: f32[8,1], index: 5, kind: input, shape index: {}]   ;;  %s3155_s6 = inlined_call_operand.vmem [shape: f32[8,1], index: 6, kind: input, shape index: {}]   ;;  %s3156_s7 = inlined_call_operand.hbm [shape: f32[2,8,256], index: 7, kind: output, shape index: {0}]   ;;  %s3157_s8 = inlined_call_operand.hbm [shape: f32[2,8,128], index: 8, kind: output, shape index: {1}]  }
   0x1   :  { %v83_v0 = vld [vmem:[%s3150_s1] sm:$0xff]  ;;  %1721 = vset.pattern.permute.xlu2 %v1790_v2  ;;  %1722 = vset.pattern.permute.xlu0 %v1790_v2  ;;  %v1606_v5 = vld [vmem:[%s3149_s0 + $0x8] ss:$4 sm:$0x3] }
   0x2   :  { %v49_v1 = vld [vmem:[%s3149_s0] ss:$4 sm:$0x3]  ;;  %86 = vperm.xlu2 %1721, %v83_v0   ;;  %1723 = vset.pattern.permute.xlu1 %v1790_v2 }
   0x3   :  { %v1851_v3 = vperm.slane %v49_v1, 1  ;;  %v1853_v4 = vperm.slane %v49_v1, 0 }
   0x5   :  { %66 = vrot.lane.b32.xlu1 %v1851_v3, %s1791_s9  ;;  %62 = vrot.lane.b32.xlu0 %v1853_v4, %s1791_s9 }
   0x6   :  { %15 = vsyncpa [#allocation6], 0  ;;  %v1862_v6 = vperm.slane %v1606_v5, 1  ;;  %v1864_v7 = vperm.slane %v1606_v5, 0  ;;  %s1792_s12 = smov 127   ;;  %v1607_v12 = vld [vmem:[%s3150_s1 + $0x8] sm:$0xff]  ;;  %v3158_v37 = vlaneseq }
   0x7   :  { %v1610_v8 = vld [vmem:[%s3149_s0 + $0x9] ss:$4 sm:$0x3]  ;;  %v1609_v9 = vld [vmem:[%s3149_s0 + $0x1] ss:$4 sm:$0x3] }
   0x8   :  { %v1884_v10 = vperm.slane %v1610_v8, 0  ;;  %v1886_v11 = vperm.slane %v1609_v9, 0  ;;  %v1895_v13 = vperm.slane %v1610_v8, 1  ;;  %v1897_v14 = vperm.slane %v1609_v9, 1  ;;  %v1608_v15 = vld [vmem:[%s3150_s1 + $0x10] sm:$0xff]  ;;  %v1611_v16 = vld [vmem:[%s3150_s1 + $0x18] sm:$0xff] }
   0x9   :  { %v1612_v17 = vld [vmem:[%s3150_s1 + $0x20] sm:$0xff]  ;;  %v1615_v18 = vld [vmem:[%s3149_s0 + $0xa] ss:$4 sm:$0x3]  ;;  %v1616_v25 = vld [vmem:[%s3150_s1 + $0x30] sm:$0xff]  ;;  %v1996_v38 = vand.u32 127, %v3158_v37 }
   0xa   :  { %116 = vrot.lane.b32.xlu2 %v1853_v4, %s1792_s12  ;;  %v1614_v19 = vld [vmem:[%s3149_s0 + $0x2] ss:$4 sm:$0x3]  ;;  %v1926_v20 = vperm.slane %v1615_v18, 0  ;;  %v1613_v23 = vld [vmem:[%s3150_s1 + $0x28] sm:$0xff]  ;;  %v1941_v24 = vperm.slane %v1615_v18, 1 }
   0xb   :  { %v1928_v21 = vperm.slane %v1614_v19, 0  ;;  %v1930_v22 = vperm.slane %v1614_v19, 1  ;;  %v1619_v26 = vld [vmem:[%s3149_s0 + $0x3] ss:$4 sm:$0x3]  ;;  %v1617_v27 = vld [vmem:[%s3150_s1 + $0x38] sm:$0xff] }
   0xc   :  { %v1960_v28 = vperm.slane %v1619_v26, 0  ;;  %v1620_v29 = vld [vmem:[%s3149_s0 + $0xb] ss:$4 sm:$0x3]  ;;  %v1969_v30 = vperm.slane %v1619_v26, 1  ;;  %v1618_v35 = vld [vmem:[%s3150_s1 + $0x40] sm:$0xff] }
   0xd   :  { %68 = vrot.lane.b32.xlu1 %v1862_v6, %s1791_s9  ;;  %64 = vrot.lane.b32.xlu0 %v1864_v7, %s1791_s9  ;;  %v1971_v31 = vperm.slane %v1620_v29, 0  ;;  %v1973_v32 = vperm.slane %v1620_v29, 1  ;;  %v1621_v34 = vld [vmem:[%s3150_s1 + $0x48] sm:$0xff]  ;;  %v1623_v40 = vld [vmem:[%s3150_s1 + $0x58] sm:$0xff]  ;;  %v2005_v42 = vadd.s32 4294967295, %v1996_v38  ;;  %vm70_vm0 = vcmp.lt.s32.totalorder %v1996_v38, 1 }
   0xe   :  { %v1622_v41 = vld [vmem:[%s3150_s1 + $0x50] sm:$0xff]  ;;  %vm124_vm2 = vcmp.lt.s32.totalorder %v1996_v38, 127  ;;  %v32_v0 = vadd.s32 128, %v1996_v38  ;;  %s1794_s13 = smov [#allocation3]   ;;  %s1795_s15 = smov 256  }
   0xf   :  { %vm35_vm1 = vcmp.ge.s32.totalorder %v2005_v42, 0  ;;  %s1574_s14 = sshll.u32 %s1794_s13, 4  ;;  %s1796_s16 = smov 16   ;;  %s1575_s14 = int_to_ptr.vmem [resolvable:$true] %s1574_s14 }
  0x10   :  { %s1797_s17 = smov [#allocation5]   ;;  %s1589_s0 = sshll.u32 %s3157_s8, 4  ;;  %s1590_s0 = int_to_ptr.hbm [resolvable:$true] %s1589_s0 }
  0x11   :  { %s1587_s18 = sshll.u32 %s1797_s17, 4  ;;  %s1799_s21 = smov 8   ;;  %s1588_s18 = int_to_ptr.vmem [resolvable:$true] %s1587_s18 }
  0x12   :  { %122 = vrot.lane.b32.xlu2 %v1862_v6, %s1792_s12 }
  0x15   :  { %120 = vrot.lane.b32.xlu1 %v1851_v3, %s1792_s12  ;;  %118 = vrot.lane.b32.xlu0 %v1864_v7, %s1792_s12 }
  0x1a   :  { %172 = vrot.lane.b32.xlu2 %v1884_v10, %s1791_s9 }
  0x1d   :  { %170 = vrot.lane.b32.xlu1 %v1886_v11, %s1791_s9  ;;  %105 = vperm.xlu0 %1722, %v1607_v12   ;;  %v2031_v12 = vadd.s32 1, %v32_v0 }
  0x1f   :  { %vm46_vm3 = vcmp.lt.s32.totalorder %v2031_v12, 256 }
  0x22   :  { %176 = vrot.lane.b32.xlu2 %v1895_v13, %s1791_s9 }
  0x25   :  { %174 = vrot.lane.b32.xlu1 %v1897_v14, %s1791_s9  ;;  %141 = vperm.xlu0 %1722, %v1608_v15  }
  0x2a   :  { %220 = vrot.lane.b32.xlu2 %v1886_v11, %s1792_s12 }
  0x2d   :  { %190 = vperm.xlu1 %1723, %v1611_v16   ;;  %222 = vrot.lane.b32.xlu0 %v1884_v10, %s1792_s12 }
  0x32   :  { %226 = vrot.lane.b32.xlu2 %v1895_v13, %s1792_s12 }
  0x35   :  { %224 = vrot.lane.b32.xlu1 %v1897_v14, %s1792_s12  ;;  %209 = vperm.xlu0 %1722, %v1612_v17  }
  0x3a   :  { %271 = vrot.lane.b32.xlu2 %v1926_v20, %s1791_s9 }
  0x3d   :  { %269 = vrot.lane.b32.xlu1 %v1928_v21, %s1791_s9  ;;  %273 = vrot.lane.b32.xlu0 %v1930_v22, %s1791_s9 }
  0x42   :  { %240 = vperm.xlu2 %1721, %v1613_v23  }
  0x45   :  { %275 = vrot.lane.b32.xlu1 %v1941_v24, %s1791_s9  ;;  %289 = vperm.xlu0 %1722, %v1616_v25  }
  0x4a   :  { %321 = vrot.lane.b32.xlu2 %v1926_v20, %s1792_s12 }
  0x4d   :  { %319 = vrot.lane.b32.xlu1 %v1928_v21, %s1792_s12  ;;  %323 = vrot.lane.b32.xlu0 %v1930_v22, %s1792_s12 }
  0x52   :  { %308 = vperm.xlu2 %1721, %v1617_v27  }
  0x55   :  { %325 = vrot.lane.b32.xlu1 %v1941_v24, %s1792_s12  ;;  %368 = vrot.lane.b32.xlu0 %v1960_v28, %s1791_s9 }
  0x5a   :  { %372 = vrot.lane.b32.xlu2 %v1969_v30, %s1791_s9 }
  0x5c   :  { %v87_v33 = vpop.permute.xlu2 %86 }
  0x5d   :  { %370 = vrot.lane.b32.xlu1 %v1971_v31, %s1791_s9  ;;  %374 = vrot.lane.b32.xlu0 %v1973_v32, %s1791_s9 }
  0x62   :  { %388 = vperm.xlu2 %1721, %v1621_v34  }
  0x64   :  { %v117_v36 = vpop.permute.xlu2 %116 }
  0x65   :  { %339 = vperm.xlu1 %1723, %v1618_v35   ;;  %418 = vrot.lane.b32.xlu0 %v1960_v28, %s1792_s12 }
  0x6a   :  { %422 = vrot.lane.b32.xlu2 %v1969_v30, %s1792_s12 }
  0x6c   :  { %v123_v39 = vpop.permute.xlu2 %122 }
  0x6d   :  { %420 = vrot.lane.b32.xlu1 %v1971_v31, %s1792_s12  ;;  %424 = vrot.lane.b32.xlu0 %v1973_v32, %s1792_s12 }
  0x72   :  { %438 = vperm.xlu2 %1721, %v1623_v40  }
  0x74   :  { %v173_v49 = vpop.permute.xlu2 %172 }
  0x75   :  { %407 = vperm.xlu1 %1723, %v1622_v41  }
  0x77   :  { %v67_v43 = vpop.permute.xlu1 %66  ;;  %v63_v44 = vpop.permute.xlu0 %62 }
  0x78   :  { %v71_v45 = vsel %vm70_vm0, %v63_v44, %v67_v43  ;;  %v73_v46 = vsel %vm70_vm0, %v67_v43, %v63_v44 }
  0x79   :  { %v79_v47 = vsel %vm35_vm1, %v73_v46, 0.0  ;;  %v90_v48 = vperm.slane %v71_v45, 0 }
  0x7a   :  { %v89_v50 = vperm.slane %v79_v47, 0 }
  0x7b   :  { %v94_v51 = vmul.f32 %v90_v48, %v87_v33 }
  0x7c   :  { %v93_v52 = vmul.f32 %v89_v50, %v87_v33  ;;  %v177_v61 = vpop.permute.xlu2 %176 }
  0x7d   :  { %v179_v48 = vsel %vm70_vm0, %v173_v49, %v177_v61 }
  0x7f   :  { %v69_v53 = vpop.permute.xlu1 %68  ;;  %v65_v54 = vpop.permute.xlu0 %64 }
  0x80   :  { %v72_v55 = vsel %vm70_vm0, %v65_v54, %v69_v53  ;;  %v74_v56 = vsel %vm70_vm0, %v69_v53, %v65_v54 }
  0x81   :  { %v81_v57 = vsel %vm35_vm1, %v74_v56, 0.0  ;;  %v92_v58 = vperm.slane %v72_v55, 0 }
  0x82   :  { %v91_v59 = vperm.slane %v81_v57, 0 }
  0x83   :  { %v96_v60 = vmul.f32 %v92_v58, %v87_v33  ;;  %v196_v58 = vperm.slane %v179_v48, 0 }
  0x84   :  { %v95_v62 = vmul.f32 %v91_v59, %v87_v33  ;;  %v2033_v15 = vpop.permute.xlu2 %220 }
  0x87   :  { %v121_v63 = vpop.permute.xlu1 %120  ;;  %v119_v1 = vpop.permute.xlu0 %118 }
  0x88   :  { %v125_v2 = vsel %vm124_vm2, %v117_v36, %v121_v63  ;;  %v127_v5 = vsel %vm124_vm2, %v121_v63, %v117_v36  ;;  %v126_v8 = vsel %vm124_vm2, %v119_v1, %v123_v39  ;;  %v128_v9 = vsel %vm124_vm2, %v123_v39, %v119_v1 }
  0x89   :  { %v134_v34 = vsel %vm46_vm3, %v127_v5, 0.0  ;;  %v136_v35 = vsel %vm46_vm3, %v128_v9, 0.0  ;;  %v144_v36 = vperm.slane %v125_v2, 0 }
  0x8a   :  { %v145_v39 = vperm.slane %v134_v34, 0  ;;  %v147_v40 = vperm.slane %v136_v35, 0 }
  0x8f   :  { %v171_v16 = vpop.permute.xlu1 %170  ;;  %v106_v17 = vpop.permute.xlu0 %105 }
  0x90   :  { %v108_v18 = vmul.f32 %v106_v17, %v1853_v4  ;;  %v109_v19 = vmul.f32 %v106_v17, %v1851_v3  ;;  %v110_v23 = vmul.f32 %v106_v17, %v1864_v7  ;;  %v111_v25 = vmul.f32 %v106_v17, %v1862_v6  ;;  %v227_v6 = vpop.permute.xlu2 %226 }
  0x91   :  { %v181_v4 = vsel %vm70_vm0, %v177_v61, %v173_v49  ;;  %v146_v3 = vperm.slane %v126_v8, 0 }
  0x92   :  { %v112_v26 = vadd.f32 %v108_v18, %v93_v52  ;;  %v113_v27 = vadd.f32 %v109_v19, %v94_v51  ;;  %v114_v29 = vadd.f32 %v110_v23, %v95_v62  ;;  %v115_v33 = vadd.f32 %v111_v25, %v96_v60 }
  0x93   :  { %v184_v50 = vsel %vm35_vm1, %v181_v4, 0.0 }
  0x94   :  { %v195_v57 = vperm.slane %v184_v50, 0 }
  0x97   :  { %v175_v7 = vpop.permute.xlu1 %174  ;;  %v142_v41 = vpop.permute.xlu0 %141 }
  0x98   :  { %v180_v43 = vsel %vm70_vm0, %v175_v7, %v171_v16  ;;  %v148_v44 = vmul.f32 %v144_v36, %v142_v41  ;;  %v149_v45 = vmul.f32 %v145_v39, %v142_v41  ;;  %v150_v46 = vmul.f32 %v146_v3, %v142_v41  ;;  %v272_v2 = vpop.permute.xlu2 %271 }
  0x99   :  { %v151_v47 = vmul.f32 %v147_v40, %v142_v41  ;;  %v178_v53 = vsel %vm70_vm0, %v171_v16, %v175_v7  ;;  %v182_v54 = vsel %vm35_vm1, %v180_v43, 0.0 }
  0x9a   :  { %v152_v51 = vadd.f32 %v148_v44, %v112_v26  ;;  %v153_v52 = vadd.f32 %v149_v45, %v113_v27  ;;  %v154_v55 = vadd.f32 %v150_v46, %v114_v29  ;;  %v193_v59 = vperm.slane %v182_v54, 0 }
  0x9b   :  { %v155_v56 = vadd.f32 %v151_v47, %v115_v33  ;;  %v194_v60 = vperm.slane %v178_v53, 0 }
  0x9f   :  { %v191_v62 = vpop.permute.xlu1 %190  ;;  %v223_v63 = vpop.permute.xlu0 %222 }
  0xa0   :  { %v197_v49 = vmul.f32 %v193_v59, %v191_v62  ;;  %v198_v61 = vmul.f32 %v194_v60, %v191_v62  ;;  %v199_v0 = vmul.f32 %v195_v57, %v191_v62  ;;  %v200_v1 = vmul.f32 %v196_v58, %v191_v62  ;;  %v241_v19 = vpop.permute.xlu2 %240 }
  0xa1   :  { %v231_v40 = vsel %vm124_vm2, %v227_v6, %v223_v63  ;;  %v229_v41 = vsel %vm124_vm2, %v223_v63, %v227_v6 }
  0xa2   :  { %v201_v5 = vadd.f32 %v197_v49, %v152_v51  ;;  %v202_v8 = vadd.f32 %v198_v61, %v153_v52  ;;  %v203_v9 = vadd.f32 %v199_v0, %v154_v55  ;;  %v204_v16 = vadd.f32 %v200_v1, %v155_v56 }
  0xa3   :  { %v235_v44 = vsel %vm46_vm3, %v231_v40, 0.0  ;;  %v245_v54 = vperm.slane %v229_v41, 0 }
  0xa4   :  { %v246_v55 = vperm.slane %v235_v44, 0 }
  0xa5   :  { %v249_v0 = vmul.f32 %v245_v54, %v241_v19 }
  0xa7   :  { %v225_v17 = vpop.permute.xlu1 %224  ;;  %v210_v18 = vpop.permute.xlu0 %209 }
  0xa8   :  { %v322_v26 = vpop.permute.xlu2 %321  ;;  %v230_v4 = vsel %vm124_vm2, %v225_v17, %v2033_v15  ;;  %v228_v7 = vsel %vm124_vm2, %v2033_v15, %v225_v17  ;;  %v212_v46 = vmul.f32 %v210_v18, %v1886_v11  ;;  %v214_v6 = vmul.f32 %v210_v18, %v1884_v10 }
  0xa9   :  { %v233_v43 = vsel %vm46_vm3, %v230_v4, 0.0  ;;  %v243_v45 = vperm.slane %v228_v7, 0  ;;  %v215_v52 = vmul.f32 %v210_v18, %v1895_v13  ;;  %v213_v11 = vmul.f32 %v210_v18, %v1897_v14 }
  0xaa   :  { %v244_v51 = vperm.slane %v233_v43, 0  ;;  %v216_v58 = vadd.f32 %v212_v46, %v201_v5  ;;  %v218_v62 = vadd.f32 %v214_v6, %v203_v9 }
  0xab   :  { %v247_v57 = vmul.f32 %v243_v45, %v241_v19  ;;  %v219_v63 = vadd.f32 %v215_v52, %v204_v16  ;;  %v217_v17 = vadd.f32 %v213_v11, %v202_v8 }
  0xac   :  { %v248_v13 = vmul.f32 %v244_v51, %v241_v19  ;;  %v253_v7 = vadd.f32 %v249_v0, %v218_v62 }
  0xad   :  { %v251_v18 = vadd.f32 %v247_v57, %v216_v58 }
  0xae   :  { %v252_v40 = vadd.f32 %v248_v13, %v217_v17 }
  0xaf   :  { %v270_v23 = vpop.permute.xlu1 %269  ;;  %v274_v25 = vpop.permute.xlu0 %273 }
  0xb0   :  { %v2056_v35 = vpop.permute.xlu2 %308  ;;  %v279_v48 = vsel %vm70_vm0, %v274_v25, %v270_v23  ;;  %v277_v59 = vsel %vm70_vm0, %v270_v23, %v274_v25 }
  0xb1   :  { %v281_v10 = vsel %vm35_vm1, %v279_v48, 0.0  ;;  %v293_v1 = vperm.slane %v277_v59, 0  ;;  %v312_v46 = vmul.f32 %v2056_v35, %v1930_v22  ;;  %v313_v11 = vmul.f32 %v2056_v35, %v1926_v20 }
  0xb2   :  { %v292_v14 = vperm.slane %v281_v10, 0 }
  0xb7   :  { %v276_v27 = vpop.permute.xlu1 %275  ;;  %v290_v29 = vpop.permute.xlu0 %289 }
  0xb8   :  { %v373_v3 = vpop.permute.xlu2 %372  ;;  %v280_v47 = vsel %vm70_vm0, %v276_v27, %v272_v2  ;;  %v278_v53 = vsel %vm70_vm0, %v272_v2, %v276_v27  ;;  %v250_v2 = vmul.f32 %v246_v55, %v241_v19  ;;  %v296_v23 = vmul.f32 %v292_v14, %v290_v29 }
  0xb9   :  { %v283_v56 = vsel %vm35_vm1, %v280_v47, 0.0  ;;  %v295_v60 = vperm.slane %v278_v53, 0  ;;  %v297_v25 = vmul.f32 %v293_v1, %v290_v29  ;;  %v311_v19 = vmul.f32 %v2056_v35, %v1928_v21 }
  0xba   :  { %v294_v49 = vperm.slane %v283_v56, 0  ;;  %v254_v41 = vadd.f32 %v250_v2, %v219_v63  ;;  %v300_v48 = vadd.f32 %v296_v23, %v251_v18 }
  0xbb   :  { %v299_v27 = vmul.f32 %v295_v60, %v290_v29 }
  0xbc   :  { %v298_v43 = vmul.f32 %v294_v49, %v290_v29  ;;  %v315_v49 = vadd.f32 %v311_v19, %v300_v48 }
  0xbe   :  { %v302_v6 = vadd.f32 %v298_v43, %v253_v7 }
  0xbf   :  { %v320_v33 = vpop.permute.xlu1 %319  ;;  %v324_v34 = vpop.permute.xlu0 %323 }
  0xc0   :  { %v2088_v61 = vpop.permute.xlu2 %388  ;;  %v329_v5 = vsel %vm124_vm2, %v324_v34, %v320_v33  ;;  %v327_v8 = vsel %vm124_vm2, %v320_v33, %v324_v34  ;;  %v301_v33 = vadd.f32 %v297_v25, %v252_v40  ;;  %v303_v34 = vadd.f32 %v299_v27, %v254_v41 }
  0xc1   :  { %v332_v44 = vsel %vm46_vm3, %v329_v5, 0.0 }
  0xc2   :  { %v316_v0 = vadd.f32 %v312_v46, %v301_v33 }
  0xc7   :  { %v326_v36 = vpop.permute.xlu1 %325  ;;  %v369_v39 = vpop.permute.xlu0 %368 }
  0xc8   :  { %v330_v4 = vsel %vm124_vm2, %v326_v36, %v322_v26  ;;  %v328_v45 = vsel %vm124_vm2, %v322_v26, %v326_v36  ;;  %v378_v29 = vsel %vm70_vm0, %v373_v3, %v369_v39  ;;  %v376_v51 = vsel %vm70_vm0, %v369_v39, %v373_v3  ;;  %v423_v3 = vpop.permute.xlu2 %422 }
  0xc9   :  { %v334_v47 = vsel %vm46_vm3, %v330_v4, 0.0  ;;  %v342_v26 = vperm.slane %v327_v8, 0  ;;  %v343_v36 = vperm.slane %v332_v44, 0  ;;  %v344_v52 = vperm.slane %v328_v45, 0 }
  0xca   :  { %v345_v22 = vperm.slane %v334_v47, 0  ;;  %v380_v53 = vsel %vm35_vm1, %v378_v29, 0.0  ;;  %v314_v39 = vmul.f32 %v2056_v35, %v1941_v24  ;;  %v392_v56 = vperm.slane %v376_v51, 0 }
  0xcb   :  { %v317_v24 = vadd.f32 %v313_v11, %v302_v6 }
  0xcc   :  { %v318_v35 = vadd.f32 %v314_v39, %v303_v34  ;;  %v396_v4 = vmul.f32 %v392_v56, %v2088_v61 }
  0xcf   :  { %v371_v50 = vpop.permute.xlu1 %370  ;;  %v375_v15 = vpop.permute.xlu0 %374 }
  0xd0   :  { %v379_v21 = vsel %vm70_vm0, %v375_v15, %v371_v50  ;;  %v377_v54 = vsel %vm70_vm0, %v371_v50, %v375_v15  ;;  %v391_v15 = vperm.slane %v380_v53, 0  ;;  %v439_v47 = vpop.permute.xlu2 %438 }
  0xd1   :  { %v382_v55 = vsel %vm35_vm1, %v379_v21, 0.0  ;;  %v394_v63 = vperm.slane %v377_v54, 0 }
  0xd2   :  { %v393_v62 = vperm.slane %v382_v55, 0  ;;  %v395_v27 = vmul.f32 %v391_v15, %v2088_v61  ;;  %v1627_v15 = vld [vmem:[%s3153_s4 + $0x20] sm:$0xff] }
  0xd7   :  { %v340_v9 = vpop.permute.xlu1 %339  ;;  %v419_v16 = vpop.permute.xlu0 %418 }
  0xd8   :  { %v346_v57 = vmul.f32 %v342_v26, %v340_v9  ;;  %v347_v58 = vmul.f32 %v343_v36, %v340_v9  ;;  %v348_v59 = vmul.f32 %v344_v52, %v340_v9  ;;  %v349_v10 = vmul.f32 %v345_v22, %v340_v9 }
  0xd9   :  { %v428_v60 = vsel %vm124_vm2, %v423_v3, %v419_v16  ;;  %v426_v14 = vsel %vm124_vm2, %v419_v16, %v423_v3  ;;  %v397_v9 = vmul.f32 %v393_v62, %v2088_v61  ;;  %v398_v16 = vmul.f32 %v394_v63, %v2088_v61  ;;  %v1630_v62 = vld [vmem:[%s3153_s4 + $0x38] sm:$0xff]  ;;  %v1633_v63 = vld [vmem:[%s3153_s4 + $0x50] sm:$0xff] }
  0xda   :  { %v431_v1 = vsel %vm46_vm3, %v428_v60, 0.0  ;;  %v350_v18 = vadd.f32 %v346_v57, %v315_v49  ;;  %v351_v5 = vadd.f32 %v347_v58, %v316_v0  ;;  %v352_v23 = vadd.f32 %v348_v59, %v317_v24  ;;  %v1624_v58 = vld [vmem:[%s3153_s4 + $0x8] sm:$0xff]  ;;  %v547_v59 = vld [vmem:[%s3153_s4] sm:$0xff]  ;;  %v1625_v60 = vld [vmem:[%s3153_s4 + $0x10] sm:$0xff] }
  0xdb   :  { %v353_v25 = vadd.f32 %v349_v10, %v318_v35  ;;  %v441_v40 = vperm.slane %v426_v14, 0  ;;  %v442_v7 = vperm.slane %v431_v1, 0  ;;  %v1626_v10 = vld [vmem:[%s3153_s4 + $0x18] sm:$0xff]  ;;  %v1632_v49 = vld [vmem:[%s3153_s4 + $0x48] sm:$0xff]  ;;  %v1635_v0 = vld [vmem:[%s3153_s4 + $0x60] sm:$0xff] }
  0xdc   :  { %v399_v8 = vadd.f32 %v395_v27, %v350_v18  ;;  %v400_v44 = vadd.f32 %v396_v4, %v351_v5  ;;  %v401_v45 = vadd.f32 %v397_v9, %v352_v23  ;;  %v1634_v24 = vld [vmem:[%s3153_s4 + $0x58] sm:$0xff]  ;;  %v1637_v35 = vld [vmem:[%s3153_s4 + $0x70] sm:$0xff]  ;;  %v1640_v14 = vld [vmem:[%s3153_s4 + $0x88] sm:$0xff] }
  0xdd   :  { %v402_v46 = vadd.f32 %v398_v16, %v353_v25  ;;  %v445_v34 = vmul.f32 %v441_v40, %v439_v47  ;;  %v446_v61 = vmul.f32 %v442_v7, %v439_v47  ;;  %v1636_v1 = vld [vmem:[%s3153_s4 + $0x68] sm:$0xff]  ;;  %v1638_v18 = vld [vmem:[%s3153_s4 + $0x78] sm:$0xff]  ;;  %v1641_v5 = vld [vmem:[%s3153_s4 + $0x90] sm:$0xff] }
  0xde   :  { %v1644_v23 = vld [vmem:[%s3153_s4 + $0xa8] sm:$0xff]  ;;  %v1643_v25 = vld [vmem:[%s3153_s4 + $0xa0] sm:$0xff] }
  0xdf   :  { %v421_v13 = vpop.permute.xlu1 %420  ;;  %v425_v50 = vpop.permute.xlu0 %424 }
  0xe0   :  { %v429_v20 = vsel %vm124_vm2, %v425_v50, %v421_v13  ;;  %v427_v2 = vsel %vm124_vm2, %v421_v13, %v425_v50  ;;  %v1628_v13 = vld [vmem:[%s3153_s4 + $0x28] sm:$0xff]  ;;  %v1631_v50 = vld [vmem:[%s3153_s4 + $0x40] sm:$0xff] }
  0xe1   :  { %v433_v17 = vsel %vm46_vm3, %v429_v20, 0.0  ;;  %v443_v41 = vperm.slane %v427_v2, 0  ;;  %v1629_v20 = vld [vmem:[%s3153_s4 + $0x30] sm:$0xff]  ;;  %v1639_v2 = vld [vmem:[%s3153_s4 + $0x80] sm:$0xff] }
  0xe2   :  { %v444_v43 = vperm.slane %v433_v17, 0  ;;  %v1642_v17 = vld [vmem:[%s3153_s4 + $0x98] sm:$0xff] }
  0xe3   :  { %v447_v51 = vmul.f32 %v443_v41, %v439_v47 }
  0xe4   :  { %v448_v6 = vmul.f32 %v444_v43, %v439_v47 }
  0xe7   :  { %v408_v19 = vpop.permute.xlu1 %407 }
  0xe8   :  { %v410_v29 = vmul.f32 %v408_v19, %v1960_v28  ;;  %v411_v21 = vmul.f32 %v408_v19, %v1969_v30  ;;  %v412_v48 = vmul.f32 %v408_v19, %v1971_v31  ;;  %v413_v33 = vmul.f32 %v408_v19, %v1973_v32 }
  0xea   :  { %v414_v26 = vadd.f32 %v410_v29, %v399_v8  ;;  %v415_v36 = vadd.f32 %v411_v21, %v400_v44  ;;  %v416_v52 = vadd.f32 %v412_v48, %v401_v45  ;;  %v417_v22 = vadd.f32 %v413_v33, %v402_v46 }
  0xec   :  { %v2142_v53 = vadd.f32 %v447_v51, %v416_v52  ;;  %v2144_v54 = vadd.f32 %v448_v6, %v417_v22  ;;  %v2146_v55 = vadd.f32 %v445_v34, %v414_v26  ;;  %v2148_v28 = vadd.f32 %v446_v61, %v415_v36  ;;  %v487_v34 = vld [vmem:[%s3151_s2] sm:$0xff] }
  0xed   :  { %v489_v6 = vld [vmem:[%s3152_s3] sm:$0xff] }
  0xee   :  { %v456_v30 = vadd.f32 %v2144_v54, %v2142_v53  ;;  %v453_v31 = vadd.f32 %v2148_v28, %v2146_v55  ;;  %v460_v32 = vmul.f32 %v2146_v55, %v2146_v55  ;;  %v461_v11 = vmul.f32 %v2148_v28, %v2148_v28 }
  0xef   :  { %v462_v3 = vmul.f32 %v2142_v53, %v2142_v53  ;;  %v463_v56 = vmul.f32 %v2144_v54, %v2144_v54 }
  0xf0   :  { %457 = vadd.xlane.f32.xlu1 %v456_v30  ;;  %454 = vadd.xlane.f32.xlu0 %v453_v31  ;;  %v464_v39 = vadd.f32 %v461_v11, %v460_v32 }
  0xf1   :  { %v467_v57 = vadd.f32 %v463_v56, %v462_v3 }
  0xf2   :  { %465 = vadd.xlane.f32.xlu2 %v464_v39 }
  0xfa   :  { %468 = vadd.xlane.f32.xlu2 %v467_v57 }
 0x104   :  { %569 = vperm.xlu0 %1722, %v1624_v58  }
 0x109   :  { %550 = vperm.xlu1 %1723, %v547_v59  }
 0x10c   :  { %649 = vperm.xlu0 %1722, %v1626_v10  }
 0x111   :  { %600 = vperm.xlu1 %1723, %v1625_v60  }
 0x112   :  { %699 = vperm.xlu2 %1721, %v1628_v13  }
 0x114   :  { %798 = vperm.xlu0 %1722, %v1631_v50  }
 0x119   :  { %668 = vperm.xlu1 %1723, %v1627_v15  }
 0x11a   :  { %767 = vperm.xlu2 %1721, %v1630_v62  }
 0x11c   :  { %866 = vperm.xlu0 %1722, %v1633_v63  }
 0x121   :  { %748 = vperm.xlu1 %1723, %v1629_v20  }
 0x122   :  { %847 = vperm.xlu2 %1721, %v1632_v49  }
 0x124   :  { %946 = vperm.xlu0 %1722, %v1635_v0  }
 0x129   :  { %897 = vperm.xlu1 %1723, %v1634_v24  }
 0x12a   :  { %996 = vperm.xlu2 %1721, %v1637_v35  }
 0x12c   :  { %1095 = vperm.xlu0 %1722, %v1640_v14  }
 0x131   :  { %965 = vperm.xlu1 %1723, %v1636_v1  }
 0x132   :  { %1064 = vperm.xlu2 %1721, %v1639_v2  }
 0x134   :  { %1163 = vperm.xlu0 %1722, %v1642_v17  }
 0x139   :  { %1045 = vperm.xlu1 %1723, %v1638_v18  }
 0x13a   :  { %1144 = vperm.xlu2 %1721, %v1641_v5  }
 0x13c   :  { %1243 = vperm.xlu0 %1722, %v1644_v23  }
 0x141   :  { %1194 = vperm.xlu1 %1723, %v1643_v25  }
 0x163   :  { %v458_v27 = vpop.xlane.xlu1 %457  ;;  %v455_v4 = vpop.xlane.xlu0 %454 }
 0x164   :  { %v459_v16 = vadd.f32 %v458_v27, %v455_v4 }
 0x165   :  { %v466_v9 = vpop.xlane.xlu2 %465 }
 0x166   :  { %v471_v40 = vmul.f32 0.001953125, %v459_v16 }
 0x168   :  { %v473_v43 = vmul.f32 %v471_v40, %v471_v40 }
 0x16d   :  { %v469_v7 = vpop.xlane.xlu2 %468 }
 0x16e   :  { %v470_v41 = vadd.f32 %v469_v7, %v466_v9 }
 0x170   :  { %v472_v19 = vmul.f32 0.001953125, %v470_v41 }
 0x172   :  { %v474_v8 = vsub.f32 %v472_v19, %v473_v43 }
 0x174   :  { %v475_v44 = vmax.f32 %v474_v8, 0.0 }
 0x175   :  { %v2312_v19 = vpop.permute.xlu2 %699 }
 0x176   :  { %v476_v45 = vadd.f32 1e-05, %v475_v44  ;;  %v2234_v52 = vpop.permute.xlu0 %569 }
 0x178   :  { %1734 = vrsqrt.f32 %v476_v45  ;;  %vm483_vm5 = vweird.f32 %v476_v45 }
 0x17b   :  { %v2236_v22 = vpop.permute.xlu1 %550 }
 0x17d   :  { %v2326_v44 = vpop.permute.xlu2 %767 }
 0x17e   :  { %v1735_v46 = vpop.eup %1734  ;;  %v2238_v30 = vpop.permute.xlu0 %649 }
 0x17f   :  { %v478_v47 = vmul.f32 %v1735_v46, %v476_v45  ;;  %vm484_vm4 = vweird.f32 %v1735_v46 }
 0x180   :  { %vm485_vm6 = vmor %vm483_vm5, %vm484_vm4 }
 0x181   :  { %v479_v29 = vmul.f32 %v1735_v46, %v478_v47 }
 0x183   :  { %v480_v21 = vmul.f32 0.5, %v479_v29  ;;  %v2240_v31 = vpop.permute.xlu1 %600 }
 0x185   :  { %v481_v48 = vsub.f32 1.5, %v480_v21 }
 0x186   :  { %v2242_v32 = vpop.permute.xlu0 %798 }
 0x187   :  { %v482_v33 = vmul.f32 %v1735_v46, %v481_v48  ;;  %v2340_v48 = vpop.permute.xlu2 %847 }
 0x189   :  { %v486_v61 = vsel %vm485_vm6, %v1735_v46, %v482_v33 }
 0x18a   :  { %v488_v51 = vmul.f32 %v487_v34, %v486_v61 }
 0x18b   :  { %v2244_v11 = vpop.permute.xlu1 %668 }
 0x18c   :  { %494 = vperm.xlu0 %1722, %v488_v51   ;;  %v490_v26 = vmul.f32 %v488_v51, %v471_v40 }
 0x18e   :  { %v491_v36 = vsub.f32 %v489_v6, %v490_v26  ;;  %v2246_v39 = vpop.permute.xlu0 %866 }
 0x18f   :  { %v2352_v61 = vpop.permute.xlu2 %996 }
 0x190   :  { %503 = vperm.xlu1 %1723, %v491_v36  }
 0x193   :  { %v2248_v3 = vpop.permute.xlu1 %748 }
 0x196   :  { %v2250_v56 = vpop.permute.xlu0 %946 }
 0x197   :  { %v2362_v6 = vpop.permute.xlu2 %1064 }
 0x19b   :  { %v2252_v57 = vpop.permute.xlu1 %897 }
 0x19e   :  { %v2254_v58 = vpop.permute.xlu0 %1095 }
 0x19f   :  { %3165 = vst [vmem:[#allocation9_spill] sm:$0xff] %v2254_v58 }
 0x1a3   :  { %v2256_v59 = vpop.permute.xlu1 %965 }
 0x1a6   :  { %v2258_v10 = vpop.permute.xlu0 %1163 }
 0x1a7   :  { %3166 = vst [vmem:[#allocation10_spill] sm:$0xff] %v2258_v10 }
 0x1ab   :  { %v2260_v60 = vpop.permute.xlu1 %1045 }
 0x1ac   :  { %3167 = vst [vmem:[#allocation11_spill] sm:$0xff] %v2260_v60 }
 0x1ae   :  { %v2262_v13 = vpop.permute.xlu0 %1243 }
 0x1af   :  { %3168 = vst [vmem:[#allocation12_spill] sm:$0xff] %v2262_v13 }
 0x1b3   :  { %v2264_v50 = vpop.permute.xlu1 %1194 }
 0x1b4   :  { %3169 = vst [vmem:[#allocation13_spill] sm:$0xff] %v2264_v50 }
 0x1fe   :  { %v495_v15 = vpop.permute.xlu0 %494 }
 0x1ff   :  { %v497_v62 = vmul.f32 %v495_v15, %v2146_v55  ;;  %v498_v63 = vmul.f32 %v495_v15, %v2148_v28  ;;  %v499_v20 = vmul.f32 %v495_v15, %v2142_v53  ;;  %v500_v49 = vmul.f32 %v495_v15, %v2144_v54 }
 0x202   :  { %v504_v0 = vpop.permute.xlu1 %503 }
 0x203   :  { %v506_v24 = vadd.f32 %v504_v0, %v497_v62  ;;  %v507_v35 = vadd.f32 %v504_v0, %v498_v63  ;;  %v508_v14 = vadd.f32 %v504_v0, %v499_v20  ;;  %v509_v1 = vadd.f32 %v504_v0, %v500_v49  ;;  %v2378_v62 = vpop.permute.xlu2 %1144 }
 0x204   :  { %3170 = vst [vmem:[#allocation14_spill] sm:$0xff] %v2378_v62 }
 0x205   :  { %v510_v2 = vmax.f32 %v506_v24, 0.0  ;;  %v511_v17 = vmax.f32 %v507_v35, 0.0  ;;  %v512_v18 = vmax.f32 %v508_v14, 0.0  ;;  %v513_v5 = vmax.f32 %v509_v1, 0.0 }
 0x207   :  { %514 = vst [vmem:[#allocation2] sm:$0xff] %v510_v2 }
 0x208   :  { %515 = vst [vmem:[#allocation2 + $0x8] sm:$0xff] %v511_v17 }
 0x209   :  { %516 = vst [vmem:[#allocation2 + $0x10] sm:$0xff] %v512_v18 }
 0x20a   :  { %517 = vst [vmem:[#allocation2 + $0x18] sm:$0xff] %v513_v5 }
 0x20f   :  { %v518_v55 = vld [vmem:[#allocation2] ss:$8 sm:$0x3]  ;;  %v616_v9 = vld [vmem:[#allocation2 + $0x1] ss:$8 sm:$0x3] }
 0x210   :  { %v2270_v23 = vperm.slane %v518_v55, 1  ;;  %v2272_v28 = vperm.slane %v518_v55, 0  ;;  %v2298_v16 = vperm.slane %v616_v9, 0  ;;  %v2300_v40 = vperm.slane %v616_v9, 1 }
 0x211   :  { %v520_v53 = vld [vmem:[#allocation2 + $0x10] ss:$8 sm:$0x3]  ;;  %v618_v27 = vld [vmem:[#allocation2 + $0x11] ss:$8 sm:$0x3] }
 0x212   :  { %v2274_v54 = vperm.slane %v520_v53, 0  ;;  %535 = vrot.lane.b32.xlu1 %v2270_v23, %s1791_s9  ;;  %531 = vrot.lane.b32.xlu2 %v2272_v28, %s1791_s9  ;;  %v2282_v25 = vperm.slane %v520_v53, 1  ;;  %v2290_v4 = vperm.slane %v618_v27, 0  ;;  %v715_v7 = vld [vmem:[#allocation2 + $0x2] ss:$8 sm:$0x3]  ;;  %v573_v13 = vmul.f32 %v2234_v52, %v2270_v23 }
 0x213   :  { %v2308_v41 = vperm.slane %v715_v7, 1  ;;  %v2310_v43 = vperm.slane %v618_v27, 1  ;;  %v2320_v8 = vperm.slane %v715_v7, 0  ;;  %v814_v45 = vld [vmem:[#allocation2 + $0x3] ss:$8 sm:$0x3]  ;;  %v572_v58 = vmul.f32 %v2234_v52, %v2272_v28 }
 0x214   :  { %533 = vrot.lane.b32.xlu0 %v2274_v54, %s1791_s9  ;;  %v717_v46 = vld [vmem:[#allocation2 + $0x12] ss:$8 sm:$0x3]  ;;  %v2330_v47 = vperm.slane %v814_v45, 0  ;;  %v2360_v51 = vperm.slane %v814_v45, 1 }
 0x215   :  { %v2332_v29 = vperm.slane %v717_v46, 1  ;;  %v816_v21 = vld [vmem:[#allocation2 + $0x13] ss:$8 sm:$0x3]  ;;  %v2344_v34 = vperm.slane %v717_v46, 0 }
 0x216   :  { %v2342_v33 = vperm.slane %v816_v21, 1  ;;  %v2364_v26 = vperm.slane %v816_v21, 0  ;;  %v915_v36 = vld [vmem:[#allocation2 + $0x14] ss:$8 sm:$0x3] }
 0x217   :  { %v2372_v15 = vperm.slane %v915_v36, 0  ;;  %v913_v63 = vld [vmem:[#allocation2 + $0x4] ss:$8 sm:$0x3]  ;;  %v2394_v14 = vperm.slane %v915_v36, 1 }
 0x218   :  { %v2382_v20 = vperm.slane %v913_v63, 0  ;;  %v2384_v49 = vperm.slane %v913_v63, 1  ;;  %v1012_v24 = vld [vmem:[#allocation2 + $0x5] ss:$8 sm:$0x3] }
 0x219   :  { %v2392_v35 = vperm.slane %v1012_v24, 1  ;;  %v2404_v2 = vperm.slane %v1012_v24, 0  ;;  %v2412_v18 = vld [vmem:[#allocation2 + $0x6] ss:$8 sm:$0x3] }
 0x21a   :  { %582 = vrot.lane.b32.xlu1 %v2274_v54, %s1792_s12  ;;  %580 = vrot.lane.b32.xlu2 %v2272_v28, %s1792_s12  ;;  %v1014_v5 = vld [vmem:[#allocation2 + $0x15] ss:$8 sm:$0x3]  ;;  %v2415_v55 = vperm.slane %v2412_v18, 0 }
 0x21b   :  { %v2417_v53 = vperm.slane %v1014_v5, 1  ;;  %v1113_v46 = vld [vmem:[#allocation2 + $0x16] ss:$8 sm:$0x3]  ;;  %v2438_v62 = vperm.slane %v1014_v5, 0 }
 0x21c   :  { %537 = vrot.lane.b32.xlu0 %v2282_v25, %s1791_s9  ;;  %v2436_v50 = vperm.slane %v1113_v46, 1 }
 0x222   :  { %631 = vrot.lane.b32.xlu1 %v2290_v4, %s1791_s9  ;;  %586 = vrot.lane.b32.xlu2 %v2282_v25, %s1792_s12 }
 0x224   :  { %584 = vrot.lane.b32.xlu0 %v2270_v23, %s1792_s12 }
 0x22a   :  { %681 = vrot.lane.b32.xlu1 %v2290_v4, %s1792_s12  ;;  %629 = vrot.lane.b32.xlu2 %v2298_v16, %s1791_s9 }
 0x22c   :  { %633 = vrot.lane.b32.xlu0 %v2300_v40, %s1791_s9 }
 0x232   :  { %732 = vrot.lane.b32.xlu1 %v2308_v41, %s1791_s9  ;;  %635 = vrot.lane.b32.xlu2 %v2310_v43, %s1791_s9 }
 0x234   :  { %683 = vrot.lane.b32.xlu0 %v2300_v40, %s1792_s12 }
 0x23a   :  { %782 = vrot.lane.b32.xlu1 %v2308_v41, %s1792_s12  ;;  %679 = vrot.lane.b32.xlu2 %v2298_v16, %s1792_s12 }
 0x23c   :  { %728 = vrot.lane.b32.xlu0 %v2320_v8, %s1791_s9 }
 0x242   :  { %827 = vrot.lane.b32.xlu1 %v2330_v47, %s1791_s9  ;;  %685 = vrot.lane.b32.xlu2 %v2310_v43, %s1792_s12 }
 0x244   :  { %734 = vrot.lane.b32.xlu0 %v2332_v29, %s1791_s9 }
 0x24a   :  { %833 = vrot.lane.b32.xlu1 %v2342_v33, %s1791_s9  ;;  %730 = vrot.lane.b32.xlu2 %v2344_v34, %s1791_s9 }
 0x24c   :  { %778 = vrot.lane.b32.xlu0 %v2320_v8, %s1792_s12 }
 0x252   :  { %877 = vrot.lane.b32.xlu1 %v2330_v47, %s1792_s12  ;;  %780 = vrot.lane.b32.xlu2 %v2344_v34, %s1792_s12 }
 0x254   :  { %784 = vrot.lane.b32.xlu0 %v2332_v29, %s1792_s12 }
 0x25a   :  { %883 = vrot.lane.b32.xlu1 %v2342_v33, %s1792_s12  ;;  %831 = vrot.lane.b32.xlu2 %v2360_v51, %s1791_s9 }
 0x25c   :  { %829 = vrot.lane.b32.xlu0 %v2364_v26, %s1791_s9 }
 0x262   :  { %928 = vrot.lane.b32.xlu1 %v2372_v15, %s1791_s9  ;;  %881 = vrot.lane.b32.xlu2 %v2360_v51, %s1792_s12 }
 0x264   :  { %879 = vrot.lane.b32.xlu0 %v2364_v26, %s1792_s12 }
 0x26a   :  { %978 = vrot.lane.b32.xlu1 %v2372_v15, %s1792_s12  ;;  %926 = vrot.lane.b32.xlu2 %v2382_v20, %s1791_s9 }
 0x26c   :  { %930 = vrot.lane.b32.xlu0 %v2384_v49, %s1791_s9  ;;  %v532_v0 = vpop.permute.xlu2 %531 }
 0x272   :  { %1029 = vrot.lane.b32.xlu1 %v2392_v35, %s1791_s9  ;;  %932 = vrot.lane.b32.xlu2 %v2394_v14, %s1791_s9 }
 0x274   :  { %980 = vrot.lane.b32.xlu0 %v2384_v49, %s1792_s12  ;;  %v2402_v1 = vpop.permute.xlu2 %580 }
 0x27a   :  { %1079 = vrot.lane.b32.xlu1 %v2392_v35, %s1792_s12  ;;  %976 = vrot.lane.b32.xlu2 %v2382_v20, %s1792_s12 }
 0x27c   :  { %1025 = vrot.lane.b32.xlu0 %v2404_v2, %s1791_s9  ;;  %v587_v17 = vpop.permute.xlu2 %586 }
 0x282   :  { %1124 = vrot.lane.b32.xlu1 %v2415_v55, %s1791_s9  ;;  %982 = vrot.lane.b32.xlu2 %v2394_v14, %s1792_s12 }
 0x284   :  { %1031 = vrot.lane.b32.xlu0 %v2417_v53, %s1791_s9  ;;  %v536_v27 = vpop.permute.xlu1 %535  ;;  %v2425_v9 = vpop.permute.xlu2 %629 }
 0x285   :  { %v539_v7 = vsel %vm70_vm0, %v532_v0, %v536_v27  ;;  %v541_v45 = vsel %vm70_vm0, %v536_v27, %v532_v0 }
 0x286   :  { %v534_v21 = vpop.permute.xlu0 %533  ;;  %v543_v36 = vsel %vm35_vm1, %v541_v45, 0.0  ;;  %v554_v63 = vperm.slane %v539_v7, 0 }
 0x287   :  { %v553_v24 = vperm.slane %v543_v36, 0 }
 0x288   :  { %v558_v37 = vmul.f32 %v554_v63, %v2236_v22 }
 0x289   :  { %v557_v0 = vmul.f32 %v553_v24, %v2236_v22 }
 0x28a   :  { %v577_v27 = vadd.f32 %v573_v13, %v558_v37  ;;  %1130 = vrot.lane.b32.xlu1 %v2436_v50, %s1791_s9  ;;  %1027 = vrot.lane.b32.xlu2 %v2438_v62, %s1791_s9 }
 0x28b   :  { %v576_v7 = vadd.f32 %v572_v58, %v557_v0 }
 0x28c   :  { %1075 = vrot.lane.b32.xlu0 %v2404_v2, %s1792_s12  ;;  %v583_v23 = vpop.permute.xlu1 %582  ;;  %v636_v45 = vpop.permute.xlu2 %635 }
 0x28d   :  { %v589_v5 = vsel %vm124_vm2, %v583_v23, %v587_v17  ;;  %v591_v28 = vsel %vm124_vm2, %v587_v17, %v583_v23  ;;  %v575_v17 = vmul.f32 %v2234_v52, %v2282_v25 }
 0x28e   :  { %v538_v36 = vpop.permute.xlu0 %537  ;;  %v595_v37 = vsel %vm46_vm3, %v591_v28, 0.0  ;;  %v605_v10 = vperm.slane %v589_v5, 0 }
 0x28f   :  { %v540_v13 = vsel %vm70_vm0, %v534_v21, %v538_v36  ;;  %v542_v58 = vsel %vm70_vm0, %v538_v36, %v534_v21  ;;  %v606_v63 = vperm.slane %v595_v37, 0  ;;  %v574_v21 = vmul.f32 %v2234_v52, %v2274_v54 }
 0x290   :  { %v545_v24 = vsel %vm35_vm1, %v542_v58, 0.0  ;;  %v556_v0 = vperm.slane %v540_v13, 0  ;;  %v609_v58 = vmul.f32 %v605_v10, %v2240_v31 }
 0x291   :  { %v555_v60 = vperm.slane %v545_v24, 0  ;;  %v610_v28 = vmul.f32 %v606_v63, %v2240_v31 }
 0x292   :  { %v560_v23 = vmul.f32 %v556_v0, %v2236_v22  ;;  %1174 = vrot.lane.b32.xlu1 %v2415_v55, %s1792_s12  ;;  %1077 = vrot.lane.b32.xlu2 %v2438_v62, %s1792_s12 }
 0x293   :  { %v559_v36 = vmul.f32 %v555_v60, %v2236_v22 }
 0x294   :  { %v579_v37 = vadd.f32 %v575_v17, %v560_v23  ;;  %1081 = vrot.lane.b32.xlu0 %v2417_v53, %s1792_s12  ;;  %v632_v25 = vpop.permute.xlu1 %631  ;;  %v2474_v5 = vpop.permute.xlu2 %679 }
 0x295   :  { %v578_v13 = vadd.f32 %v574_v21, %v559_v36  ;;  %v638_v63 = vsel %vm70_vm0, %v632_v25, %v636_v45  ;;  %v640_v24 = vsel %vm70_vm0, %v636_v45, %v632_v25  ;;  %v2493_v36 = vperm.slane %v2412_v18, 1 }
 0x296   :  { %v614_v0 = vadd.f32 %v610_v28, %v579_v37  ;;  %v585_v52 = vpop.permute.xlu0 %584  ;;  %v643_v22 = vsel %vm35_vm1, %v640_v24, 0.0  ;;  %v655_v60 = vperm.slane %v638_v63, 0  ;;  %v673_v18 = vmul.f32 %v2244_v11, %v2290_v4 }
 0x297   :  { %v613_v54 = vadd.f32 %v609_v58, %v578_v13  ;;  %v588_v17 = vsel %vm124_vm2, %v2402_v1, %v585_v52  ;;  %v590_v10 = vsel %vm124_vm2, %v585_v52, %v2402_v1  ;;  %v654_v23 = vperm.slane %v643_v22, 0 }
 0x298   :  { %v593_v21 = vsel %vm46_vm3, %v590_v10, 0.0  ;;  %v603_v45 = vperm.slane %v588_v17, 0  ;;  %v659_v28 = vmul.f32 %v655_v60, %v2238_v30  ;;  %v674_v13 = vmul.f32 %v2244_v11, %v2310_v43 }
 0x299   :  { %v604_v37 = vperm.slane %v593_v21, 0  ;;  %v658_v25 = vmul.f32 %v654_v23, %v2238_v30  ;;  %v2499_v1 = vperm.slane %v1113_v46, 0  ;;  %v1212_v21 = vld [vmem:[#allocation2 + $0x17] ss:$8 sm:$0x3] }
 0x29a   :  { %v607_v58 = vmul.f32 %v603_v45, %v2240_v31  ;;  %v663_v63 = vadd.f32 %v659_v28, %v614_v0  ;;  %1180 = vrot.lane.b32.xlu1 %v2436_v50, %s1792_s12  ;;  %1128 = vrot.lane.b32.xlu2 %v2493_v36, %s1791_s9 }
 0x29b   :  { %v608_v24 = vmul.f32 %v604_v37, %v2240_v31  ;;  %v662_v52 = vadd.f32 %v658_v25, %v613_v54 }
 0x29c   :  { %v611_v22 = vadd.f32 %v607_v58, %v576_v7  ;;  %v678_v60 = vadd.f32 %v674_v13, %v663_v63  ;;  %1126 = vrot.lane.b32.xlu0 %v2499_v1, %s1791_s9  ;;  %v682_v43 = vpop.permute.xlu1 %681  ;;  %v686_v46 = vpop.permute.xlu2 %685  ;;  %v2525_v13 = vperm.slane %v1212_v21, 0 }
 0x29d   :  { %v612_v0 = vadd.f32 %v608_v24, %v577_v27  ;;  %v677_v17 = vadd.f32 %v673_v18, %v662_v52  ;;  %v688_v10 = vsel %vm124_vm2, %v682_v43, %v686_v46  ;;  %v690_v23 = vsel %vm124_vm2, %v686_v46, %v682_v43 }
 0x29e   :  { %v634_v4 = vpop.permute.xlu0 %633  ;;  %v694_v31 = vsel %vm46_vm3, %v690_v23, 0.0  ;;  %v704_v7 = vperm.slane %v688_v10, 0  ;;  %v672_v43 = vmul.f32 %v2244_v11, %v2300_v40 }
 0x29f   :  { %v637_v54 = vsel %vm70_vm0, %v2425_v9, %v634_v4  ;;  %v639_v27 = vsel %vm70_vm0, %v634_v4, %v2425_v9  ;;  %v705_v45 = vperm.slane %v694_v31, 0  ;;  %v1210_v31 = vld [vmem:[#allocation2 + $0x7] ss:$8 sm:$0x3] }
 0x2a0   :  { %v641_v28 = vsel %vm35_vm1, %v639_v27, 0.0  ;;  %v653_v37 = vperm.slane %v637_v54, 0  ;;  %v708_v25 = vmul.f32 %v704_v7, %v2312_v19 }
 0x2a1   :  { %v652_v58 = vperm.slane %v641_v28, 0  ;;  %v709_v63 = vmul.f32 %v705_v45, %v2312_v19  ;;  %v2550_v45 = vperm.slane %v1210_v31, 0 }
 0x2a2   :  { %v657_v18 = vmul.f32 %v653_v37, %v2238_v30  ;;  %v2529_v24 = vadd.f32 %v708_v25, %v677_v17  ;;  %1225 = vrot.lane.b32.xlu1 %v2525_v13, %s1791_s9  ;;  %1178 = vrot.lane.b32.xlu2 %v2493_v36, %s1792_s12  ;;  %v671_v17 = vmul.f32 %v2244_v11, %v2298_v16 }
 0x2a3   :  { %v656_v9 = vmul.f32 %v652_v58, %v2238_v30  ;;  %v713_v52 = vadd.f32 %v709_v63, %v678_v60 }
 0x2a4   :  { %v661_v46 = vadd.f32 %v657_v18, %v612_v0  ;;  %1176 = vrot.lane.b32.xlu0 %v2499_v1, %s1792_s12  ;;  %v733_v10 = vpop.permute.xlu1 %732  ;;  %v731_v23 = vpop.permute.xlu2 %730 }
 0x2a5   :  { %v660_v4 = vadd.f32 %v656_v9, %v611_v22  ;;  %v2553_v22 = vperm.slane %v1210_v31, 1 }
 0x2a6   :  { %v676_v7 = vadd.f32 %v672_v43, %v661_v46  ;;  %v684_v54 = vpop.permute.xlu0 %683  ;;  %v1645_v43 = vld [vmem:[%s3153_s4 + $0xb0] sm:$0xff] }
 0x2a7   :  { %v675_v27 = vadd.f32 %v671_v17, %v660_v4  ;;  %v687_v30 = vsel %vm124_vm2, %v2474_v5, %v684_v54  ;;  %v689_v40 = vsel %vm124_vm2, %v684_v54, %v2474_v5  ;;  %v2573_v17 = vperm.slane %v1212_v21, 1 }
 0x2a8   :  { %v692_v60 = vsel %vm46_vm3, %v689_v40, 0.0  ;;  %v702_v0 = vperm.slane %v687_v30, 0  ;;  %v770_v21 = vmul.f32 %v2326_v44, %v2320_v8 }
 0x2a9   :  { %v703_v11 = vperm.slane %v692_v60, 0 }
 0x2aa   :  { %v706_v16 = vmul.f32 %v702_v0, %v2312_v19  ;;  %1275 = vrot.lane.b32.xlu1 %v2525_v13, %s1792_s12  ;;  %1223 = vrot.lane.b32.xlu2 %v2550_v45, %s1791_s9 }
 0x2ab   :  { %v707_v28 = vmul.f32 %v703_v11, %v2312_v19 }
 0x2ac   :  { %v710_v5 = vadd.f32 %v706_v16, %v675_v27  ;;  %1227 = vrot.lane.b32.xlu0 %v2553_v22, %s1791_s9  ;;  %v783_v37 = vpop.permute.xlu1 %782  ;;  %v2562_v25 = vpop.permute.xlu2 %780 }
 0x2ad   :  { %v711_v58 = vadd.f32 %v707_v28, %v676_v7 }
 0x2ae   :  { %v729_v63 = vpop.permute.xlu0 %728 }
 0x2af   :  { %v736_v18 = vsel %vm70_vm0, %v729_v63, %v733_v10  ;;  %v738_v9 = vsel %vm70_vm0, %v733_v10, %v729_v63  ;;  %v771_v10 = vmul.f32 %v2326_v44, %v2308_v41 }
 0x2b0   :  { %v740_v19 = vsel %vm35_vm1, %v738_v9, 0.0  ;;  %v752_v46 = vperm.slane %v736_v18, 0  ;;  %v1646_v18 = vld [vmem:[%s3153_s4 + $0xb8] sm:$0xff] }
 0x2b1   :  { %v751_v4 = vperm.slane %v740_v19, 0 }
 0x2b2   :  { %v756_v31 = vmul.f32 %v752_v46, %v2248_v3  ;;  %1262 = vperm.xlu1 %1723, %v1645_v43   ;;  %1229 = vrot.lane.b32.xlu2 %v2573_v17, %s1791_s9 }
 0x2b3   :  { %v755_v7 = vmul.f32 %v751_v4, %v2248_v3 }
 0x2b4   :  { %v760_v54 = vadd.f32 %v756_v31, %v711_v58  ;;  %1277 = vrot.lane.b32.xlu0 %v2553_v22, %s1792_s12  ;;  %v828_v27 = vpop.permute.xlu1 %827  ;;  %v832_v30 = vpop.permute.xlu2 %831  ;;  %v772_v31 = vmul.f32 %v2326_v44, %v2344_v34 }
 0x2b5   :  { %v759_v40 = vadd.f32 %v755_v7, %v710_v5  ;;  %v835_v60 = vsel %vm70_vm0, %v828_v27, %v832_v30  ;;  %v837_v0 = vsel %vm70_vm0, %v832_v30, %v828_v27 }
 0x2b6   :  { %v775_v11 = vadd.f32 %v771_v10, %v760_v54  ;;  %v735_v16 = vpop.permute.xlu0 %734  ;;  %v839_v10 = vsel %vm35_vm1, %v837_v0, 0.0 }
 0x2b7   :  { %v737_v41 = vsel %vm70_vm0, %v731_v23, %v735_v16  ;;  %v739_v28 = vsel %vm70_vm0, %v735_v16, %v731_v23  ;;  %v774_v58 = vadd.f32 %v770_v21, %v759_v40  ;;  %v773_v23 = vmul.f32 %v2326_v44, %v2332_v29 }
 0x2b8   :  { %v742_v63 = vsel %vm35_vm1, %v739_v28, 0.0  ;;  %v754_v8 = vperm.slane %v737_v41, 0  ;;  %v850_v30 = vperm.slane %v839_v10, 0  ;;  %v851_v44 = vperm.slane %v835_v60, 0 }
 0x2b9   :  { %v753_v5 = vperm.slane %v742_v63, 0  ;;  %v869_v16 = vmul.f32 %v2246_v39, %v2330_v47 }
 0x2ba   :  { %v758_v9 = vmul.f32 %v754_v8, %v2248_v3  ;;  %1273 = vrot.lane.b32.xlu2 %v2550_v45, %s1792_s12  ;;  %v855_v8 = vmul.f32 %v851_v44, %v2340_v48 }
 0x2bb   :  { %v757_v43 = vmul.f32 %v753_v5, %v2248_v3 }
 0x2bc   :  { %v762_v19 = vadd.f32 %v758_v9, %v713_v52  ;;  %1293 = vperm.xlu0 %1722, %v1646_v18   ;;  %v834_v46 = vpop.permute.xlu1 %833  ;;  %v882_v4 = vpop.permute.xlu2 %881  ;;  %v870_v9 = vmul.f32 %v2246_v39, %v2360_v51 }
 0x2bd   :  { %v761_v7 = vadd.f32 %v757_v43, %v2529_v24 }
 0x2be   :  { %v777_v54 = vadd.f32 %v773_v23, %v762_v19  ;;  %v779_v27 = vpop.permute.xlu0 %778 }
 0x2bf   :  { %v786_v3 = vsel %vm124_vm2, %v779_v27, %v783_v37  ;;  %v788_v29 = vsel %vm124_vm2, %v783_v37, %v779_v27  ;;  %v776_v52 = vadd.f32 %v772_v31, %v761_v7  ;;  %v854_v37 = vmul.f32 %v850_v30, %v2340_v48 }
 0x2c0   :  { %v791_v21 = vsel %vm46_vm3, %v788_v29, 0.0  ;;  %v801_v40 = vperm.slane %v786_v3, 0 }
 0x2c1   :  { %v802_v34 = vperm.slane %v791_v21, 0 }
 0x2c2   :  { %v805_v24 = vmul.f32 %v801_v40, %v2242_v32  ;;  %1279 = vrot.lane.b32.xlu2 %v2573_v17, %s1792_s12 }
 0x2c3   :  { %v806_v0 = vmul.f32 %v802_v34, %v2242_v32 }
 0x2c4   :  { %v809_v41 = vadd.f32 %v805_v24, %v774_v58  ;;  %v878_v28 = vpop.permute.xlu1 %877  ;;  %v927_v63 = vpop.permute.xlu2 %926 }
 0x2c5   :  { %v810_v5 = vadd.f32 %v806_v0, %v775_v11  ;;  %v885_v60 = vsel %vm124_vm2, %v878_v28, %v882_v4  ;;  %v887_v18 = vsel %vm124_vm2, %v882_v4, %v878_v28 }
 0x2c6   :  { %v858_v43 = vadd.f32 %v854_v37, %v809_v41  ;;  %v785_v23 = vpop.permute.xlu0 %784  ;;  %v890_v47 = vsel %vm46_vm3, %v887_v18, 0.0  ;;  %v900_v58 = vperm.slane %v885_v60, 0 }
 0x2c7   :  { %v859_v19 = vadd.f32 %v855_v8, %v810_v5  ;;  %v787_v11 = vsel %vm124_vm2, %v2562_v25, %v785_v23  ;;  %v789_v31 = vsel %vm124_vm2, %v785_v23, %v2562_v25  ;;  %v901_v7 = vperm.slane %v890_v47, 0 }
 0x2c8   :  { %v793_v4 = vsel %vm46_vm3, %v789_v31, 0.0  ;;  %v803_v51 = vperm.slane %v787_v11, 0  ;;  %v873_v10 = vadd.f32 %v869_v16, %v858_v43  ;;  %v904_v27 = vmul.f32 %v900_v58, %v2252_v57 }
 0x2c9   :  { %v804_v3 = vperm.slane %v793_v4, 0  ;;  %v874_v29 = vadd.f32 %v870_v9, %v859_v19  ;;  %v905_v30 = vmul.f32 %v901_v7, %v2252_v57 }
 0x2ca   :  { %v807_v21 = vmul.f32 %v803_v51, %v2242_v32  ;;  %v908_v40 = vadd.f32 %v904_v27, %v873_v10 }
 0x2cb   :  { %v808_v44 = vmul.f32 %v804_v3, %v2242_v32  ;;  %v909_v34 = vadd.f32 %v905_v30, %v874_v29 }
 0x2cc   :  { %v811_v24 = vadd.f32 %v807_v21, %v776_v52  ;;  %v884_v25 = vpop.permute.xlu1 %883  ;;  %v933_v0 = vpop.permute.xlu2 %932 }
 0x2cd   :  { %v812_v37 = vadd.f32 %v808_v44, %v777_v54 }
 0x2ce   :  { %v830_v41 = vpop.permute.xlu0 %829 }
 0x2cf   :  { %v836_v16 = vsel %vm70_vm0, %v830_v41, %v834_v46  ;;  %v838_v28 = vsel %vm70_vm0, %v834_v46, %v830_v41 }
 0x2d0   :  { %v841_v8 = vsel %vm35_vm1, %v838_v28, 0.0  ;;  %v853_v5 = vperm.slane %v836_v16, 0 }
 0x2d1   :  { %v852_v60 = vperm.slane %v841_v8, 0 }
 0x2d2   :  { %v857_v18 = vmul.f32 %v853_v5, %v2340_v48 }
 0x2d3   :  { %v856_v32 = vmul.f32 %v852_v60, %v2340_v48 }
 0x2d4   :  { %v861_v52 = vadd.f32 %v857_v18, %v812_v37  ;;  %v929_v9 = vpop.permute.xlu1 %928  ;;  %v977_v43 = vpop.permute.xlu2 %976 }
 0x2d5   :  { %v860_v54 = vadd.f32 %v856_v32, %v811_v24  ;;  %v937_v5 = vsel %vm70_vm0, %v933_v0, %v929_v9 }
 0x2d6   :  { %v880_v23 = vpop.permute.xlu0 %879 }
 0x2d7   :  { %v888_v16 = vsel %vm124_vm2, %v884_v25, %v880_v23 }
 0x2d8   :  { %v892_v8 = vsel %vm46_vm3, %v888_v16, 0.0 }
 0x2d9   :  { %v903_v32 = vperm.slane %v892_v8, 0 }
 0x2dc   :  { %v979_v47 = vpop.permute.xlu1 %978  ;;  %v983_v58 = vpop.permute.xlu2 %982 }
 0x2de   :  { %v931_v19 = vpop.permute.xlu0 %930 }
 0x2df   :  { %v934_v46 = vsel %vm70_vm0, %v927_v63, %v931_v19  ;;  %v936_v11 = vsel %vm70_vm0, %v931_v19, %v927_v63  ;;  %v940_v19 = vsel %vm35_vm1, %v937_v5, 0.0 }
 0x2e0   :  { %v938_v31 = vsel %vm35_vm1, %v936_v11, 0.0  ;;  %v950_v7 = vperm.slane %v934_v46, 0  ;;  %v872_v46 = vmul.f32 %v2246_v39, %v2342_v33  ;;  %v935_v11 = vsel %vm70_vm0, %v929_v9, %v933_v0 }
 0x2e1   :  { %v949_v4 = vperm.slane %v938_v31, 0  ;;  %v951_v31 = vperm.slane %v940_v19, 0  ;;  %v952_v9 = vperm.slane %v935_v11, 0 }
 0x2e2   :  { %v954_v48 = vmul.f32 %v950_v7, %v2250_v56  ;;  %v907_v7 = vmul.f32 %v903_v32, %v2252_v57  ;;  %v876_v16 = vadd.f32 %v872_v46, %v861_v52  ;;  %v987_v52 = vsel %vm124_vm2, %v983_v58, %v979_v47 }
 0x2e3   :  { %v953_v51 = vmul.f32 %v949_v4, %v2250_v56  ;;  %v955_v8 = vmul.f32 %v951_v31, %v2250_v56  ;;  %v956_v19 = vmul.f32 %v952_v9, %v2250_v56  ;;  %v3172_v9 = vld [vmem:[#allocation11_spill] sm:$0xff] }
 0x2e4   :  { %v2659_v10 = vadd.f32 %v954_v48, %v909_v34  ;;  %v1030_v27 = vpop.permute.xlu1 %1029  ;;  %v1028_v3 = vpop.permute.xlu2 %1027  ;;  %v911_v32 = vadd.f32 %v907_v7, %v876_v16 }
 0x2e5   :  { %v2661_v29 = vadd.f32 %v953_v51, %v908_v40  ;;  %v886_v40 = vsel %vm124_vm2, %v880_v23, %v884_v25  ;;  %v871_v25 = vmul.f32 %v2246_v39, %v2364_v26 }
 0x2e6   :  { %v981_v30 = vpop.permute.xlu0 %980  ;;  %v902_v18 = vperm.slane %v886_v40, 0  ;;  %v969_v40 = vmul.f32 %v2256_v59, %v2384_v49  ;;  %v985_v49 = vsel %vm124_vm2, %v979_v47, %v983_v58 }
 0x2e7   :  { %v986_v4 = vsel %vm124_vm2, %v981_v30, %v977_v43  ;;  %v875_v0 = vadd.f32 %v871_v25, %v860_v54  ;;  %v984_v39 = vsel %vm124_vm2, %v977_v43, %v981_v30  ;;  %v968_v54 = vmul.f32 %v2256_v59, %v2382_v20 }
 0x2e8   :  { %v906_v23 = vmul.f32 %v902_v18, %v2252_v57  ;;  %v970_v57 = vmul.f32 %v2256_v59, %v2372_v15  ;;  %v989_v5 = vsel %vm46_vm3, %v986_v4, 0.0  ;;  %v2718_v15 = vmul.f32 %v2362_v6, %v2392_v35  ;;  %v3171_v4 = vld [vmem:[#allocation10_spill] sm:$0xff] }
 0x2e9   :  { %v999_v30 = vperm.slane %v984_v39, 0  ;;  %v1000_v46 = vperm.slane %v989_v5, 0  ;;  %v971_v20 = vmul.f32 %v2256_v59, %v2394_v14  ;;  %v1067_v35 = vmul.f32 %v2362_v6, %v2404_v2 }
 0x2ea   :  { %v910_v18 = vadd.f32 %v906_v23, %v875_v0  ;;  %v991_v25 = vsel %vm46_vm3, %v987_v52, 0.0  ;;  %v960_v23 = vadd.f32 %v956_v19, %v911_v32  ;;  %v1001_v56 = vperm.slane %v985_v49, 0 }
 0x2eb   :  { %v1003_v59 = vmul.f32 %v999_v30, %v2352_v61  ;;  %v1002_v16 = vperm.slane %v991_v25, 0  ;;  %v972_v0 = vadd.f32 %v968_v54, %v2661_v29 }
 0x2ec   :  { %v2663_v21 = vpop.permute.xlu1 %1079  ;;  %v2665_v44 = vpop.permute.xlu2 %1077  ;;  %v959_v58 = vadd.f32 %v955_v8, %v910_v18  ;;  %v1005_v29 = vmul.f32 %v1001_v56, %v2352_v61 }
 0x2ed   :  { %v1007_v54 = vadd.f32 %v1003_v59, %v972_v0  ;;  %v1006_v19 = vmul.f32 %v1002_v16, %v2352_v61 }
 0x2ee   :  { %v1026_v63 = vpop.permute.xlu0 %1025  ;;  %v974_v32 = vadd.f32 %v970_v57, %v959_v58  ;;  %v2788_v58 = vmul.f32 %v3171_v4, %v2436_v50 }
 0x2ef   :  { %v1035_v51 = vsel %vm70_vm0, %v1030_v27, %v1026_v63  ;;  %v1033_v11 = vsel %vm70_vm0, %v1026_v63, %v1030_v27  ;;  %v2739_v63 = vmul.f32 %v2362_v6, %v2417_v53 }
 0x2f0   :  { %v1037_v43 = vsel %vm35_vm1, %v1035_v51, 0.0  ;;  %v1049_v14 = vperm.slane %v1033_v11, 0  ;;  %v2746_v51 = vmul.f32 %v3171_v4, %v2415_v55  ;;  %v975_v55 = vadd.f32 %v971_v20, %v960_v23 }
 0x2f1   :  { %v1048_v47 = vperm.slane %v1037_v43, 0  ;;  %v973_v43 = vadd.f32 %v969_v40, %v2659_v10  ;;  %v1009_v56 = vadd.f32 %v1005_v29, %v974_v32 }
 0x2f2   :  { %v1053_v49 = vmul.f32 %v1049_v14, %v3172_v9 }
 0x2f3   :  { %v1052_v39 = vmul.f32 %v1048_v47, %v3172_v9 }
 0x2f4   :  { %v2667_v24 = vpop.permute.xlu1 %1124  ;;  %v2669_v37 = vpop.permute.xlu2 %1128 }
 0x2f5   :  { %v1056_v10 = vadd.f32 %v1052_v39, %v1007_v54  ;;  %v1132_v11 = vsel %vm70_vm0, %v2667_v24, %v2669_v37 }
 0x2f6   :  { %v1032_v41 = vpop.permute.xlu0 %1031 }
 0x2f7   :  { %v1036_v31 = vsel %vm70_vm0, %v1032_v41, %v1028_v3  ;;  %v1034_v7 = vsel %vm70_vm0, %v1028_v3, %v1032_v41  ;;  %v1004_v3 = vmul.f32 %v1000_v46, %v2352_v61 }
 0x2f8   :  { %v1039_v2 = vsel %vm35_vm1, %v1036_v31, 0.0  ;;  %v1051_v53 = vperm.slane %v1034_v7, 0  ;;  %v1010_v7 = vadd.f32 %v1006_v19, %v975_v55 }
 0x2f9   :  { %v1050_v52 = vperm.slane %v1039_v2, 0  ;;  %v1008_v46 = vadd.f32 %v1004_v3, %v973_v43  ;;  %v3174_v43 = vld [vmem:[#allocation14_spill] sm:$0xff] }
 0x2fa   :  { %v1055_v40 = vmul.f32 %v1051_v53, %v3172_v9  ;;  %v1071_v53 = vadd.f32 %v1067_v35, %v1056_v10 }
 0x2fb   :  { %v1054_v61 = vmul.f32 %v1050_v52, %v3172_v9  ;;  %v1057_v23 = vadd.f32 %v1053_v49, %v1008_v46 }
 0x2fc   :  { %v2673_v34 = vpop.permute.xlu1 %1130  ;;  %v2675_v28 = vpop.permute.xlu2 %1178  ;;  %v1059_v9 = vadd.f32 %v1055_v40, %v1010_v7  ;;  %v1168_v7 = vmul.f32 %v3171_v4, %v2499_v1 }
 0x2fd   :  { %v1058_v3 = vadd.f32 %v1054_v61, %v1009_v56 }
 0x2fe   :  { %v1076_v60 = vpop.permute.xlu0 %1075  ;;  %v1074_v49 = vadd.f32 %v2739_v63, %v1059_v9 }
 0x2ff   :  { %v1083_v8 = vsel %vm124_vm2, %v1076_v60, %v2663_v21  ;;  %v1085_v5 = vsel %vm124_vm2, %v2663_v21, %v1076_v60  ;;  %v1134_v21 = vsel %vm70_vm0, %v2669_v37, %v2667_v24 }
 0x300   :  { %v1088_v60 = vsel %vm46_vm3, %v1085_v5, 0.0  ;;  %v1098_v57 = vperm.slane %v1083_v8, 0  ;;  %v1136_v24 = vsel %vm35_vm1, %v1134_v21, 0.0  ;;  %v1069_v8 = vmul.f32 %v2362_v6, %v2438_v62 }
 0x301   :  { %v1099_v37 = vperm.slane %v1088_v60, 0  ;;  %v1147_v39 = vperm.slane %v1136_v24, 0  ;;  %v1072_v5 = vadd.f32 %v2718_v15, %v1057_v23 }
 0x302   :  { %v1073_v19 = vadd.f32 %v1069_v8, %v1058_v3 }
 0x304   :  { %v2695_v48 = vpop.permute.xlu1 %1174  ;;  %v2699_v33 = vpop.permute.xlu2 %1223 }
 0x305   :  { %v1184_v32 = vsel %vm124_vm2, %v2675_v28, %v2695_v48  ;;  %v1182_v54 = vsel %vm124_vm2, %v2695_v48, %v2675_v28 }
 0x306   :  { %v1082_v26 = vpop.permute.xlu0 %1081  ;;  %v1187_v21 = vsel %vm46_vm3, %v1184_v32, 0.0  ;;  %v1197_v63 = vperm.slane %v1182_v54, 0 }
 0x307   :  { %v1086_v30 = vsel %vm124_vm2, %v1082_v26, %v2665_v44  ;;  %v1084_v31 = vsel %vm124_vm2, %v2665_v44, %v1082_v26  ;;  %v1148_v44 = vperm.slane %v1132_v11, 0  ;;  %v3173_v26 = vld [vmem:[#allocation9_spill] sm:$0xff] }
 0x308   :  { %v1090_v20 = vsel %vm46_vm3, %v1086_v30, 0.0  ;;  %v1102_v59 = vmul.f32 %v1098_v57, %v3173_v26  ;;  %v1100_v2 = vperm.slane %v1084_v31, 0  ;;  %v1103_v55 = vmul.f32 %v1099_v37, %v3173_v26 }
 0x309   :  { %v1101_v16 = vperm.slane %v1090_v20, 0  ;;  %v1152_v6 = vmul.f32 %v1148_v44, %v3174_v43  ;;  %v1151_v30 = vmul.f32 %v1147_v39, %v3174_v43 }
 0x30a   :  { %v1104_v62 = vmul.f32 %v1100_v2, %v3173_v26  ;;  %v1107_v57 = vadd.f32 %v1103_v55, %v1072_v5  ;;  %v3175_v2 = vld [vmem:[#allocation13_spill] sm:$0xff] }
 0x30b   :  { %v1105_v15 = vmul.f32 %v1101_v16, %v3173_v26  ;;  %v1201_v16 = vmul.f32 %v1197_v63, %v3175_v2 }
 0x30c   :  { %v2735_v27 = vpop.permute.xlu1 %1180  ;;  %v2757_v18 = vpop.permute.xlu2 %1229  ;;  %v1108_v31 = vadd.f32 %v1104_v62, %v1073_v19  ;;  %v1156_v44 = vadd.f32 %v1152_v6, %v1107_v57 }
 0x30d   :  { %v1109_v20 = vadd.f32 %v1105_v15, %v1074_v49 }
 0x30e   :  { %v1127_v41 = vpop.permute.xlu0 %1126 }
 0x30f   :  { %v1135_v25 = vsel %vm70_vm0, %v2673_v34, %v1127_v41  ;;  %v1133_v0 = vsel %vm70_vm0, %v1127_v41, %v2673_v34  ;;  %v1106_v41 = vadd.f32 %v1102_v59, %v1071_v53 }
 0x310   :  { %v1138_v50 = vsel %vm35_vm1, %v1135_v25, 0.0  ;;  %v1150_v52 = vperm.slane %v1133_v0, 0  ;;  %v1198_v25 = vperm.slane %v1187_v21, 0 }
 0x311   :  { %v1149_v29 = vperm.slane %v1138_v50, 0  ;;  %v1155_v48 = vadd.f32 %v1151_v30, %v1106_v41 }
 0x312   :  { %v1154_v11 = vmul.f32 %v1150_v52, %v3174_v43  ;;  %v1202_v50 = vmul.f32 %v1198_v25, %v3175_v2 }
 0x313   :  { %v1153_v40 = vmul.f32 %v1149_v29, %v3174_v43  ;;  %v1170_v0 = vadd.f32 %v2746_v51, %v1155_v48  ;;  %v3176_v29 = vld [vmem:[#allocation12_spill] sm:$0xff] }
 0x314   :  { %v1226_v47 = vpop.permute.xlu1 %1225  ;;  %v2806_v34 = vpop.permute.xlu2 %1273 }
 0x315   :  { %v1234_v28 = vsel %vm70_vm0, %v2757_v18, %v1226_v47  ;;  %v1232_v37 = vsel %vm70_vm0, %v1226_v47, %v2757_v18  ;;  %v1157_v18 = vadd.f32 %v1153_v40, %v1108_v31  ;;  %v1158_v47 = vadd.f32 %v1154_v11, %v1109_v20 }
 0x316   :  { %v1177_v14 = vpop.permute.xlu0 %1176  ;;  %v1237_v56 = vsel %vm35_vm1, %v1234_v28, 0.0  ;;  %v1249_v3 = vperm.slane %v1232_v37, 0  ;;  %v1205_v5 = vadd.f32 %v1201_v16, %v1170_v0 }
 0x317   :  { %v1185_v35 = vsel %vm124_vm2, %v2735_v27, %v1177_v14  ;;  %v1183_v46 = vsel %vm124_vm2, %v1177_v14, %v2735_v27  ;;  %v1167_v14 = vmul.f32 %v3171_v4, %v2493_v36  ;;  %v1248_v1 = vperm.slane %v1237_v56, 0 }
 0x318   :  { %v1189_v10 = vsel %vm46_vm3, %v1185_v35, 0.0  ;;  %v1199_v23 = vperm.slane %v1183_v46, 0  ;;  %v1173_v36 = vadd.f32 %v2788_v58, %v1158_v47  ;;  %v1172_v4 = vadd.f32 %v1168_v7, %v1157_v18 }
 0x319   :  { %v1200_v24 = vperm.slane %v1189_v10, 0  ;;  %v1171_v8 = vadd.f32 %v1167_v14, %v1156_v44  ;;  %v1252_v52 = vmul.f32 %v1248_v1, %v3176_v29  ;;  %v1253_v35 = vmul.f32 %v1249_v3, %v3176_v29 }
 0x31a   :  { %v1203_v39 = vmul.f32 %v1199_v23, %v3175_v2 }
 0x31b   :  { %v1206_v41 = vadd.f32 %v1202_v50, %v1171_v8 }
 0x31c   :  { %v1276_v60 = vpop.permute.xlu1 %1275  ;;  %v1280_v9 = vpop.permute.xlu2 %1279  ;;  %v1207_v6 = vadd.f32 %v1203_v39, %v1172_v4 }
 0x31d   :  { %v1284_v55 = vsel %vm124_vm2, %v1280_v9, %v1276_v60  ;;  %v1282_v54 = vsel %vm124_vm2, %v1276_v60, %v1280_v9 }
 0x31e   :  { %v1228_v61 = vpop.permute.xlu0 %1227  ;;  %v1288_v49 = vsel %vm46_vm3, %v1284_v55, 0.0  ;;  %v1256_v28 = vadd.f32 %v1252_v52, %v1207_v6  ;;  %v1298_v40 = vperm.slane %v1282_v54, 0  ;;  %v2907_v54 = vmul.u32 2, %v1996_v38 }
 0x31f   :  { %v1233_v27 = vsel %vm70_vm0, %v1228_v61, %v2699_v33  ;;  %v1231_v26 = vsel %vm70_vm0, %v2699_v33, %v1228_v61  ;;  %v1204_v33 = vmul.f32 %v1200_v24, %v3175_v2  ;;  %v1299_v11 = vperm.slane %v1288_v49, 0 }
 0x320   :  { %v1235_v59 = vsel %vm35_vm1, %v1233_v27, 0.0  ;;  %v1247_v53 = vperm.slane %v1231_v26, 0 }
 0x321   :  { %v1246_v42 = vperm.slane %v1235_v59, 0  ;;  %v1208_v62 = vadd.f32 %v1204_v33, %v1173_v36 }
 0x322   :  { %v1251_v58 = vmul.f32 %v1247_v53, %v3176_v29 }
 0x323   :  { %v1250_v15 = vmul.f32 %v1246_v42, %v3176_v29  ;;  %v1257_v60 = vadd.f32 %v1253_v35, %v1208_v62  ;;  %v1342_v29 = vld [vmem:[%s3154_s5] sm:$0xff] }
 0x324   :  { %v1263_v32 = vpop.permute.xlu1 %1262  ;;  %v1255_v63 = vadd.f32 %v1251_v58, %v1206_v41 }
 0x325   :  { %v1265_v30 = vmul.f32 %v1263_v32, %v2550_v45  ;;  %v1266_v19 = vmul.f32 %v1263_v32, %v2553_v22  ;;  %v1267_v46 = vmul.f32 %v1263_v32, %v2525_v13  ;;  %v1268_v10 = vmul.f32 %v1263_v32, %v2573_v17 }
 0x326   :  { %v1278_v51 = vpop.permute.xlu0 %1277  ;;  %v1254_v48 = vadd.f32 %v1250_v15, %v1205_v5  ;;  %v3177_v15 = vlaneseq }
 0x327   :  { %v1283_v43 = vsel %vm124_vm2, %v1278_v51, %v2806_v34  ;;  %v1281_v21 = vsel %vm124_vm2, %v2806_v34, %v1278_v51  ;;  %v1270_v31 = vadd.f32 %v1266_v19, %v1255_v63  ;;  %v1271_v20 = vadd.f32 %v1267_v46, %v1256_v28 }
 0x328   :  { %v1286_v57 = vsel %vm46_vm3, %v1283_v43, 0.0  ;;  %v1296_v45 = vperm.slane %v1281_v21, 0  ;;  %v1269_v22 = vadd.f32 %v1265_v30, %v1254_v48  ;;  %v1272_v25 = vadd.f32 %v1268_v10, %v1257_v60  ;;  %v1344_v43 = vld [vmem:[%s3155_s6] sm:$0xff] }
 0x329   :  { %v1297_v61 = vperm.slane %v1286_v57, 0  ;;  %v2904_v58 = vshrl.u32 %v3177_v15, 7  ;;  %v1793_v60 = vmov 1.0  }
 0x32b   :  { %v1405_v49 = vadd.s32 120, %v2904_v58  ;;  %v1421_v30 = vadd.s32 248, %v2904_v58  ;;  %v1404_v19 = vadd.s32 112, %v2904_v58  ;;  %v1420_v21 = vadd.s32 240, %v2904_v58 }
 0x32c   :  { %v1403_v57 = vadd.s32 104, %v2904_v58  ;;  %v1419_v46 = vadd.s32 232, %v2904_v58  ;;  %v1402_v10 = vadd.s32 96, %v2904_v58  ;;  %v1418_v28 = vadd.s32 224, %v2904_v58 }
 0x32d   :  { %vm1438_vm10 = vcmp.eq.s32.totalorder %v1405_v49, %v2907_v54  ;;  %vm1454_vm11 = vcmp.eq.s32.totalorder %v1421_v30, %v2907_v54  ;;  %vm1437_vm12 = vcmp.eq.s32.totalorder %v1404_v19, %v2907_v54  ;;  %vm1453_vm13 = vcmp.eq.s32.totalorder %v1420_v21, %v2907_v54 }
 0x32e   :  { %v1294_v34 = vpop.permute.xlu0 %1293  ;;  %1679 = vmatpush.msk.msra.mxu2 %vm1438_vm10, %v1793_v60  ;;  %1695 = vmatpush.msk.msra.mxu3 %vm1454_vm11, %v1793_v60  ;;  %vm1436_vm14 = vcmp.eq.s32.totalorder %v1403_v57, %v2907_v54  ;;  %vm1452_vm15 = vcmp.eq.s32.totalorder %v1419_v46, %v2907_v54  ;;  %v1401_v48 = vadd.s32 88, %v2904_v58  ;;  %v1417_v63 = vadd.s32 216, %v2904_v58 }
 0x32f   :  { %v1300_v27 = vmul.f32 %v1296_v45, %v1294_v34  ;;  %v1301_v12 = vmul.f32 %v1297_v61, %v1294_v34  ;;  %v1302_v23 = vmul.f32 %v1298_v40, %v1294_v34  ;;  %v1303_v24 = vmul.f32 %v1299_v11, %v1294_v34  ;;  %1647 = vmatpush.msk.msra.mxu0 %vm1438_vm10, %v1793_v60 }
 0x330   :  { %1663 = vmatpush.msk.msra.mxu1 %vm1454_vm11, %v1793_v60  ;;  %1680 = vmatpush.msk.msra.mxu2 %vm1437_vm12, %v1793_v60  ;;  %vm1435_vm0 = vcmp.eq.s32.totalorder %v1402_v10, %v2907_v54  ;;  %vm1451_vm1 = vcmp.eq.s32.totalorder %v1418_v28, %v2907_v54  ;;  %v1400_v40 = vadd.s32 80, %v2904_v58  ;;  %v1416_v11 = vadd.s32 208, %v2904_v58 }
 0x331   :  { %v2877_v13 = vadd.f32 %v1302_v23, %v1271_v20  ;;  %v2879_v17 = vadd.f32 %v1303_v24, %v1272_v25  ;;  %v2881_v37 = vadd.f32 %v1300_v27, %v1269_v22  ;;  %v2883_v56 = vadd.f32 %v1301_v12, %v1270_v31  ;;  %1696 = vmatpush.msk.msra.mxu3 %vm1453_vm13, %v1793_v60 }
 0x332   :  { %1648 = vmatpush.msk.msra.mxu0 %vm1437_vm12, %v1793_v60  ;;  %1664 = vmatpush.msk.msra.mxu1 %vm1453_vm13, %v1793_v60  ;;  %vm1434_vm3 = vcmp.eq.s32.totalorder %v1401_v48, %v2907_v54  ;;  %vm1450_vm4 = vcmp.eq.s32.totalorder %v1417_v63, %v2907_v54  ;;  %v1399_v45 = vadd.s32 72, %v2904_v58  ;;  %v1415_v61 = vadd.s32 200, %v2904_v58 }
 0x333   :  { %v1311_v7 = vadd.f32 %v2879_v17, %v2877_v13  ;;  %v1308_v44 = vadd.f32 %v2883_v56, %v2881_v37  ;;  %v1315_v26 = vmul.f32 %v2881_v37, %v2881_v37  ;;  %v1316_v59 = vmul.f32 %v2883_v56, %v2883_v56  ;;  %1681 = vmatpush.msk.msra.mxu2 %vm1436_vm14, %v1793_v60 }
 0x334   :  { %v1317_v2 = vmul.f32 %v2877_v13, %v2877_v13  ;;  %v1318_v16 = vmul.f32 %v2879_v17, %v2879_v17  ;;  %1697 = vmatpush.msk.msra.mxu3 %vm1452_vm15, %v1793_v60  ;;  %1649 = vmatpush.msk.msra.mxu0 %vm1436_vm14, %v1793_v60  ;;  %vm1433_vm5 = vcmp.eq.s32.totalorder %v1400_v40, %v2907_v54  ;;  %v1398_v22 = vadd.s32 64, %v2904_v58 }
 0x335   :  { %1312 = vadd.xlane.f32.xlu1 %v1311_v7  ;;  %1309 = vadd.xlane.f32.xlu2 %v1308_v44  ;;  %v1319_v14 = vadd.f32 %v1316_v59, %v1315_v26  ;;  %vm1449_vm6 = vcmp.eq.s32.totalorder %v1416_v11, %v2907_v54  ;;  %v1414_v31 = vadd.s32 192, %v2904_v58  ;;  %v1397_v20 = vadd.s32 56, %v2904_v58 }
 0x336   :  { %v1322_v18 = vadd.f32 %v1318_v16, %v1317_v2  ;;  %1665 = vmatpush.msk.msra.mxu1 %vm1452_vm15, %v1793_v60  ;;  %1682 = vmatpush.msk.msra.mxu2 %vm1435_vm0, %v1793_v60  ;;  %v1413_v25 = vadd.s32 184, %v2904_v58  ;;  %v1396_v34 = vadd.s32 48, %v2904_v58  ;;  %v1412_v27 = vadd.s32 176, %v2904_v58 }
 0x337   :  { %1320 = vadd.xlane.f32.xlu0 %v1319_v14  ;;  %1698 = vmatpush.msk.msra.mxu3 %vm1451_vm1, %v1793_v60  ;;  %vm1447_vm10 = vcmp.eq.s32.totalorder %v1414_v31, %v2907_v54  ;;  %vm1430_vm11 = vcmp.eq.s32.totalorder %v1397_v20, %v2907_v54  ;;  %v1395_v12 = vadd.s32 40, %v2904_v58  ;;  %v1411_v23 = vadd.s32 168, %v2904_v58 }
 0x338   :  { %1650 = vmatpush.msk.msra.mxu0 %vm1435_vm0, %v1793_v60  ;;  %1666 = vmatpush.msk.msra.mxu1 %vm1451_vm1, %v1793_v60  ;;  %vm1446_vm12 = vcmp.eq.s32.totalorder %v1413_v25, %v2907_v54  ;;  %vm1429_vm13 = vcmp.eq.s32.totalorder %v1396_v34, %v2907_v54  ;;  %v1394_v24 = vadd.s32 32, %v2904_v58  ;;  %v1410_v7 = vadd.s32 160, %v2904_v58 }
 0x339   :  { %1683 = vmatpush.msk.msra.mxu2 %vm1434_vm3, %v1793_v60  ;;  %1699 = vmatpush.msk.msra.mxu3 %vm1450_vm4, %v1793_v60  ;;  %vm1445_vm14 = vcmp.eq.s32.totalorder %v1412_v27, %v2907_v54  ;;  %vm1428_vm15 = vcmp.eq.s32.totalorder %v1395_v12, %v2907_v54  ;;  %v1393_v26 = vadd.s32 24, %v2904_v58  ;;  %v1409_v59 = vadd.s32 152, %v2904_v58 }
 0x33a   :  { %1651 = vmatpush.msk.msra.mxu0 %vm1434_vm3, %v1793_v60  ;;  %1667 = vmatpush.msk.msra.mxu1 %vm1450_vm4, %v1793_v60  ;;  %vm1444_vm0 = vcmp.eq.s32.totalorder %v1411_v23, %v2907_v54  ;;  %vm1427_vm1 = vcmp.eq.s32.totalorder %v1394_v24, %v2907_v54  ;;  %vm1443_vm3 = vcmp.eq.s32.totalorder %v1410_v7, %v2907_v54 }
 0x33b   :  { %1684 = vmatpush.msk.msra.mxu2 %vm1433_vm5, %v1793_v60  ;;  %1700 = vmatpush.msk.msra.mxu3 %vm1449_vm6, %v1793_v60  ;;  %vm1426_vm4 = vcmp.eq.s32.totalorder %v1393_v26, %v2907_v54 }
 0x33c   :  { %1652 = vmatpush.msk.msra.mxu0 %vm1433_vm5, %v1793_v60  ;;  %1668 = vmatpush.msk.msra.mxu1 %vm1449_vm6, %v1793_v60  ;;  %vm1442_vm5 = vcmp.eq.s32.totalorder %v1409_v59, %v2907_v54 }
 0x33d   :  { %1323 = vadd.xlane.f32.xlu2 %v1322_v18 }
 0x3a8   :  { %v1313_v47 = vpop.xlane.xlu1 %1312  ;;  %v1310_v0 = vpop.xlane.xlu2 %1309 }
 0x3a9   :  { %v1314_v50 = vadd.f32 %v1313_v47, %v1310_v0 }
 0x3aa   :  { %v1321_v3 = vpop.xlane.xlu0 %1320 }
 0x3ab   :  { %v1326_v1 = vmul.f32 0.001953125, %v1314_v50 }
 0x3ad   :  { %v1328_v33 = vmul.f32 %v1326_v1, %v1326_v1 }
 0x3b0   :  { %v1324_v9 = vpop.xlane.xlu2 %1323 }
 0x3b1   :  { %v1325_v39 = vadd.f32 %v1324_v9, %v1321_v3 }
 0x3b3   :  { %v1327_v42 = vmul.f32 0.001953125, %v1325_v39 }
 0x3b5   :  { %v1329_v53 = vsub.f32 %v1327_v42, %v1328_v33  ;;  %v1392_v33 = vadd.s32 16, %v2904_v58  ;;  %v1408_v42 = vadd.s32 144, %v2904_v58 }
 0x3b7   :  { %v1330_v8 = vmax.f32 %v1329_v53, 0.0  ;;  %v1391_v53 = vadd.s32 8, %v2904_v58  ;;  %vm1425_vm6 = vcmp.eq.s32.totalorder %v1392_v33, %v2907_v54 }
 0x3b9   :  { %v1331_v5 = vadd.f32 1e-05, %v1330_v8  ;;  %v1407_v8 = vadd.s32 136, %v2904_v58 }
 0x3bb   :  { %1736 = vrsqrt.f32 %v1331_v5  ;;  %vm1338_vm8 = vweird.f32 %v1331_v5 }
 0x3c1   :  { %v1737_v36 = vpop.eup %1736 }
 0x3c2   :  { %v1333_v4 = vmul.f32 %v1737_v36, %v1331_v5  ;;  %vm1339_vm7 = vweird.f32 %v1737_v36  ;;  %v1406_v5 = vadd.s32 128, %v2904_v58 }
 0x3c3   :  { %vm1340_vm9 = vmor %vm1338_vm8, %vm1339_vm7  ;;  %vm1432_vm7 = vcmp.eq.s32.totalorder %v1399_v45, %v2907_v54  ;;  %vm1448_vm8 = vcmp.eq.s32.totalorder %v1415_v61, %v2907_v54 }
 0x3c4   :  { %v1334_v55 = vmul.f32 %v1737_v36, %v1333_v4  ;;  %1685 = vmatpush.msk.msra.mxu2 %vm1432_vm7, %v1793_v60  ;;  %1701 = vmatpush.msk.msra.mxu3 %vm1448_vm8, %v1793_v60 }
 0x3c5   :  { %1653 = vmatpush.msk.msra.mxu0 %vm1432_vm7, %v1793_v60  ;;  %1669 = vmatpush.msk.msra.mxu1 %vm1448_vm8, %v1793_v60  ;;  %vm1441_vm7 = vcmp.eq.s32.totalorder %v1408_v42, %v2907_v54  ;;  %vm1424_vm8 = vcmp.eq.s32.totalorder %v1391_v53, %v2907_v54 }
 0x3c6   :  { %v1335_v51 = vmul.f32 0.5, %v1334_v55  ;;  %1702 = vmatpush.msk.msra.mxu3 %vm1447_vm10, %v1793_v60 }
 0x3c7   :  { %1670 = vmatpush.msk.msra.mxu1 %vm1447_vm10, %v1793_v60  ;;  %vm1423_vm10 = vcmp.eq.s32.totalorder %v2904_v58, %v2907_v54 }
 0x3c8   :  { %v1336_v32 = vsub.f32 1.5, %v1335_v51  ;;  %1703 = vmatpush.msk.msra.mxu3 %vm1446_vm12, %v1793_v60 }
 0x3c9   :  { %1671 = vmatpush.msk.msra.mxu1 %vm1446_vm12, %v1793_v60 }
 0x3ca   :  { %v1337_v41 = vmul.f32 %v1737_v36, %v1336_v32  ;;  %1704 = vmatpush.msk.msra.mxu3 %vm1445_vm14, %v1793_v60 }
 0x3cb   :  { %1672 = vmatpush.msk.msra.mxu1 %vm1445_vm14, %v1793_v60 }
 0x3cc   :  { %v1341_v52 = vsel %vm1340_vm9, %v1737_v36, %v1337_v41  ;;  %vm1431_vm9 = vcmp.eq.s32.totalorder %v1398_v22, %v2907_v54  ;;  %1705 = vmatpush.msk.msra.mxu3 %vm1444_vm0, %v1793_v60 }
 0x3cd   :  { %v1343_v35 = vmul.f32 %v1342_v29, %v1341_v52  ;;  %1686 = vmatpush.msk.msra.mxu2 %vm1431_vm9, %v1793_v60  ;;  %1654 = vmatpush.msk.msra.mxu0 %vm1431_vm9, %v1793_v60  ;;  %vm1440_vm9 = vcmp.eq.s32.totalorder %v1407_v8, %v2907_v54 }
 0x3ce   :  { %1706 = vmatpush.msk.msra.mxu3 %vm1443_vm3, %v1793_v60  ;;  %1673 = vmatpush.msk.msra.mxu1 %vm1444_vm0, %v1793_v60 }
 0x3cf   :  { %1349 = vperm.xlu1 %1723, %v1343_v35   ;;  %v1345_v6 = vmul.f32 %v1343_v35, %v1326_v1  ;;  %1687 = vmatpush.msk.msra.mxu2 %vm1430_vm11, %v1793_v60 }
 0x3d0   :  { %1655 = vmatpush.msk.msra.mxu0 %vm1430_vm11, %v1793_v60  ;;  %1707 = vmatpush.msk.msra.mxu3 %vm1442_vm5, %v1793_v60  ;;  %vm1439_vm11 = vcmp.eq.s32.totalorder %v1406_v5, %v2907_v54 }
 0x3d1   :  { %v1346_v62 = vsub.f32 %v1344_v43, %v1345_v6  ;;  %1688 = vmatpush.msk.msra.mxu2 %vm1429_vm13, %v1793_v60  ;;  %1674 = vmatpush.msk.msra.mxu1 %vm1443_vm3, %v1793_v60 }
 0x3d2   :  { %1656 = vmatpush.msk.msra.mxu0 %vm1429_vm13, %v1793_v60  ;;  %1708 = vmatpush.msk.msra.mxu3 %vm1441_vm7, %v1793_v60 }
 0x3d3   :  { %1358 = vperm.xlu0 %1722, %v1346_v62   ;;  %1689 = vmatpush.msk.msra.mxu2 %vm1428_vm15, %v1793_v60 }
 0x3d4   :  { %1657 = vmatpush.msk.msra.mxu0 %vm1428_vm15, %v1793_v60  ;;  %1675 = vmatpush.msk.msra.mxu1 %vm1442_vm5, %v1793_v60 }
 0x3d5   :  { %1690 = vmatpush.msk.msra.mxu2 %vm1427_vm1, %v1793_v60  ;;  %1709 = vmatpush.msk.msra.mxu3 %vm1440_vm9, %v1793_v60 }
 0x3d6   :  { %1658 = vmatpush.msk.msra.mxu0 %vm1427_vm1, %v1793_v60  ;;  %1676 = vmatpush.msk.msra.mxu1 %vm1441_vm7, %v1793_v60 }
 0x3d7   :  { %1691 = vmatpush.msk.msra.mxu2 %vm1426_vm4, %v1793_v60  ;;  %1710 = vmatpush.msk.msra.mxu3 %vm1439_vm11, %v1793_v60 }
 0x3d8   :  { %1659 = vmatpush.msk.msra.mxu0 %vm1426_vm4, %v1793_v60  ;;  %1677 = vmatpush.msk.msra.mxu1 %vm1440_vm9, %v1793_v60 }
 0x3d9   :  { %1692 = vmatpush.msk.msra.mxu2 %vm1425_vm6, %v1793_v60 }
 0x3da   :  { %1660 = vmatpush.msk.msra.mxu0 %vm1425_vm6, %v1793_v60  ;;  %1678 = vmatpush.msk.msra.mxu1 %vm1439_vm11, %v1793_v60 }
 0x3db   :  { %1693 = vmatpush.msk.msra.mxu2 %vm1424_vm8, %v1793_v60 }
 0x3dc   :  { %1661 = vmatpush.msk.msra.mxu0 %vm1424_vm8, %v1793_v60 }
 0x3dd   :  { %1694 = vmatpush.msk.msra.mxu2 %vm1423_vm10, %v1793_v60 }
 0x3de   :  { %1662 = vmatpush.msk.msra.mxu0 %vm1423_vm10, %v1793_v60 }
 0x441   :  { %v1350_v44 = vpop.permute.xlu1 %1349 }
 0x442   :  { %v1352_v14 = vmul.f32 %v1350_v44, %v2881_v37  ;;  %v1353_v2 = vmul.f32 %v1350_v44, %v2883_v56  ;;  %v1354_v16 = vmul.f32 %v1350_v44, %v2877_v13  ;;  %v1355_v18 = vmul.f32 %v1350_v44, %v2879_v17 }
 0x445   :  { %v1359_v37 = vpop.permute.xlu0 %1358 }
 0x446   :  { %v1361_v13 = vadd.f32 %v1359_v37, %v1352_v14  ;;  %v1362_v17 = vadd.f32 %v1359_v37, %v1353_v2  ;;  %v1363_v56 = vadd.f32 %v1359_v37, %v1354_v16  ;;  %v1364_v47 = vadd.f32 %v1359_v37, %v1355_v18 }
 0x448   :  { %v1365_v0 = vmax.f32 %v1361_v13, 0.0  ;;  %v1366_v50 = vmax.f32 %v1362_v17, 0.0  ;;  %v1367_v1 = vmax.f32 %v1363_v56, 0.0  ;;  %v1368_v3 = vmax.f32 %v1364_v47, 0.0 }
 0x44a   :  { %1369 = vst [vmem:[#allocation3] sm:$0xff] %v1365_v0  ;;  %v1724_v9 = vpack.i.bf16 %v1368_v3, %v1367_v1  ;;  %v1729_v39 = vpack.i.bf16 %v1366_v50, %v1365_v0 }
 0x44b   :  { %1370 = vst [vmem:[#allocation3 + $0x8] sm:$0xff] %v1366_v50 }
 0x44c   :  { %1371 = vst [vmem:[#allocation3 + $0x10] sm:$0xff] %v1367_v1  ;;  %1725 = vrot.lane.b32.xlu2 %v1724_v9, %s1792_s12  ;;  %1730 = vrot.lane.b32.xlu0 %v1729_v39, %s1792_s12  ;;  %s1576_s12 = sshll.u32 %s3156_s7, 4  ;;  %s1798_s7 = smov 128   ;;  %s1577_s12 = int_to_ptr.hbm [resolvable:$true] %s1576_s12 }
 0x44d   :  { %1372 = vst [vmem:[#allocation3 + $0x18] sm:$0xff] %v1368_v3 }
 0x44e   :  { %1582 = dma.vmem_to_hbm [thread:$0]  %s1575_s14, 512, %s1577_s12, [#allocation4], %s1795_s15, %s1795_s15, %s1796_s16  }
 0x4a6   :  { %v1726_v36 = vpop.permute.xlu2 %1725 }
 0x4a7   :  { %v1728_v4 = vunpack.i.h.bf16 %v1726_v36  ;;  %v1727_v55 = vunpack.i.l.bf16 %v1726_v36 }
 0x4a9   :  { %v1382_v51 = vsel %vm124_vm2, %v1727_v55, %v1728_v4  ;;  %v1384_v32 = vsel %vm124_vm2, %v1728_v4, %v1727_v55 }
 0x4aa   :  { %v1387_v41 = vmax.f32 %v1367_v1, %v1382_v51  ;;  %v1388_v29 = vmax.f32 %v1368_v3, %v1384_v32 }
 0x4ac   :  { %1544 = vmatmul.f32.vlgmr.msra.gmra.mxu2 %v1387_v41  ;;  %1564 = vmatmul.f32.vlgmr.msra.gmra.mxu3 %v1388_v29 }
 0x4be   :  { %v1731_v52 = vpop.permute.xlu0 %1730 }
 0x4bf   :  { %v1733_v35 = vunpack.i.h.bf16 %v1731_v52  ;;  %v1732_v43 = vunpack.i.l.bf16 %v1731_v52 }
 0x4c1   :  { %v1381_v6 = vsel %vm124_vm2, %v1732_v43, %v1733_v35  ;;  %v1383_v62 = vsel %vm124_vm2, %v1733_v35, %v1732_v43 }
 0x4c2   :  { %v1385_v15 = vmax.f32 %v1365_v0, %v1381_v6  ;;  %v1386_v58 = vmax.f32 %v1366_v50, %v1383_v62 }
 0x4c4   :  { %1503 = vmatmul.f32.vlgmr.msra.gmra.mxu0 %v1385_v15  ;;  %1523 = vmatmul.f32.vlgmr.msra.gmra.mxu1 %v1386_v58 }
 0x52f   :  { %v1545_v54 = vpop.f32.mrf.mxu2  ;;  %v1565_v49 = vpop.f32.mrf.mxu3 }
 0x530   :  { %v1566_v30 = vadd.f32 %v1565_v49, %v1545_v54 }
 0x532   :  { %1569 = vst [vmem:[#allocation5 + $0x8] sm:$0xff] %v1566_v30 }
 0x541   :  { %v1504_v38 = vpop.f32.mrf.mxu0  ;;  %v1524_v19 = vpop.f32.mrf.mxu1 }
 0x542   :  { %v1525_v21 = vadd.f32 %v1524_v19, %v1504_v38 }
 0x544   :  { %1527 = vst [vmem:[#allocation5] sm:$0xff] %v1525_v21 }
 0x545   :  { %1595 = dma.vmem_to_hbm [thread:$0]  %s1588_s18, 256, %s1590_s0, [#allocation6], %s1798_s7, %s1798_s7, %s1799_s21  }
 0x546   :  { %1786 = dma.done.wait [#allocation4], 512  }
 0x547   :  { %1787 = vsyncadd [#allocation4], 4294966784 }
 0x548   :  { %1788 = dma.done.wait [#allocation6], 256  }
 0x549   :  { %1789 = vsyncadd [#allocation6], 4294967040 }
 0x54a   :  { %1604 = vsyncpa [#allocation4], 1 }
 0x54b   :  { %1605 = vsyncpa [#allocation6], 1 }

</bundles_post_ra>
